<compile_context>
chip_gen: v7x
topology: tpu7x:2x2x1
jax: 0.10.0
libtpu: 0.0.40
codegen_flags: <defaults>
</compile_context>

<pallas_src>
import jax
import jax.numpy as jnp
from jax.experimental import pallas as pl
from jax.experimental.pallas import tpu as pltpu

EPS = 1e-5
K_IN = 1000   # input feature dim fixed by the module
K_PAD = 1024  # zero-padded contraction dim (clean (sub)lane tiling, exact)
F1, F2 = 512, 128


def _bn_relu_train(h, gamma, beta):
    """Train-mode BatchNorm1d fused to per-feature scale/shift, then ReLU.

    Batch stats over axis 0, biased variance (single-pass moments), eps=1e-5.
    All math in f32.
    """
    mean = jnp.mean(h, axis=0, keepdims=True)              # [1, F]
    msq = jnp.mean(h * h, axis=0, keepdims=True)           # [1, F]
    var = jnp.maximum(msq - mean * mean, 0.0)               # biased variance
    scale = gamma * jax.lax.rsqrt(var + EPS)                 # [1, F]
    shift = beta - mean * scale                              # [1, F]
    return jnp.maximum(h * scale + shift, 0.0)


def _dequant_bf16(q):
    # int8 -> f32 -> bf16 (two-step cast keeps the Mosaic lowering on the
    # well-trodden path; values are integers in [-127,127], exact in bf16).
    return q.astype(jnp.float32).astype(jnp.bfloat16)


def net_kernel(x_ref,
               q1_ref, s1_ref, g1_ref, be1_ref,
               q2_ref, s2_ref, g2_ref, be2_ref,
               wt_ref, bt_ref,
               o_ref, xp_ref):
    # in-kernel pad + cast: x [B,1000] f32 -> [B,1024] bf16 (zero tail), so
    # the wrapper does not need a separate pad/cast dispatch per call.
    xp_ref[...] = jnp.zeros_like(xp_ref)
    xp_ref[:, :K_IN] = x_ref[...].astype(jnp.bfloat16)

    # encoder layer 1: Linear(1000->512) with int8 weight (per-column dequant
    # scale applied to the f32 product); bias b1 cancelled by train-mode BN.
    h = jnp.dot(xp_ref[...], _dequant_bf16(q1_ref[...]),
                preferred_element_type=jnp.float32) * s1_ref[...]
    h = _bn_relu_train(h, g1_ref[...], be1_ref[...])

    # encoder layer 2: Linear(512->128), same int8 scheme; b2 cancelled by BN.
    h = jnp.dot(h.astype(jnp.bfloat16), _dequant_bf16(q2_ref[...]),
                preferred_element_type=jnp.float32) * s2_ref[...]
    h = _bn_relu_train(h, g2_ref[...], be2_ref[...])

    # folded tail: Linear(128,32)->Linear(32,16)->Linear(16,1) as one affine
    # map, computed as elementwise mul + lane reduction (avoids N=32/16/1
    # degenerate MXU matmuls).
    out = jnp.sum(h * wt_ref[...], axis=-1, keepdims=True) + bt_ref[...]
    o_ref[...] = out.astype(o_ref.dtype)


def net_forward(x, kparams):
    """x: [B, 1000] f32 (raw, unpadded); kparams from prepare_kernel_params."""
    B, k_in = x.shape
    assert k_in == K_IN
    vmem = pl.BlockSpec(memory_space=pltpu.MemorySpace.VMEM)
    n_in = 1 + len(kparams)

    flops = 2 * B * (K_PAD * F1 + F1 * F2 + F2)
    bytes_accessed = int(x.size * x.dtype.itemsize + B * 4
                         + sum(int(p.size) * p.dtype.itemsize for p in kparams))

    # Whole-array single-block kernel: total VMEM footprint (int8 weights +
    # bf16 dequant intermediates + activations) is a few MiB, far below the
    # scoped default on v5e/v6e/v7x.
    # TODO(synk): for repeated inference, keep the ~0.6 MiB of weights
    # VMEM-resident across calls (pltpu.with_memory_space_constraint or the
    # cross-pallas_call SEMAPHORE+VMEM prefetch pattern) so the steady-state
    # per-call cost drops to launch overhead.
    # TODO(synk): for large B, switch to a batch-tiled grid: constant
    # index_maps for all weight/BN params (DMA'd once, resident across batch
    # tiles), >=512-row batch tiles (multiples of 256 on v6e/v7x, 128 on
    # v5e), batch axis marked "parallel" for v7x's 2 TensorCores, global
    # (sum/sumsq) batch statistics for BN, and vmem_limit_bytes sized against
    # v7x's 64 MiB VMEM.
    return pl.pallas_call(
        net_kernel,
        out_shape=jax.ShapeDtypeStruct((B, 1), jnp.float32),
        in_specs=[vmem] * n_in,
        out_specs=vmem,
        scratch_shapes=[pltpu.VMEM((B, K_PAD), jnp.bfloat16)],
        compiler_params=pltpu.CompilerParams(dimension_semantics=()),
        cost_estimate=pl.CostEstimate(flops=flops,
                                      transcendentals=F1 + F2,
                                      bytes_accessed=bytes_accessed),
    )(x, *kparams)


def init_params(key):
    """Deterministic PyTorch-style init: U(-1/sqrt(fan_in), 1/sqrt(fan_in)).

    Returns raw f32 params in [in, out] layout (transpose of PyTorch's
    [out, in]) plus BN affine params (gamma=1, beta=0).
    """
    dims = [(1000, 512), (512, 128), (128, 32), (32, 16), (16, 1)]
    keys = jax.random.split(key, 2 * len(dims))
    ws, bs = [], []
    for i, (fi, fo) in enumerate(dims):
        bound = 1.0 / jnp.sqrt(jnp.float32(fi))
        ws.append(jax.random.uniform(keys[2 * i], (fi, fo), jnp.float32,
                                     -bound, bound))
        bs.append(jax.random.uniform(keys[2 * i + 1], (1, fo), jnp.float32,
                                     -bound, bound))
    bn = dict(g1=jnp.ones((1, F1), jnp.float32),
              be1=jnp.zeros((1, F1), jnp.float32),
              g2=jnp.ones((1, F2), jnp.float32),
              be2=jnp.zeros((1, F2), jnp.float32))
    return ws, bs, bn


def _quantize_int8_per_col(w):
    """Symmetric per-output-column int8 quantization: w ~= q * scale."""
    amax = jnp.max(jnp.abs(w), axis=0, keepdims=True)       # [1, out]
    scale = jnp.maximum(amax, 1e-12) / 127.0
    q = jnp.clip(jnp.round(w / scale), -127.0, 127.0).astype(jnp.int8)
    return q, scale.astype(jnp.float32)


def prepare_kernel_params(ws, bs, bn):
    """Wrapper-side (one-time) weight transforms for the kernel.

    Returns (kparams, ref_quant); ref_quant = (q1, s1, q2, s2) (q1 unpadded)
    is used by the precision-matched reference.
    """
    w1, w2, w3, w4, w5 = ws
    b1, b2, b3, b4, b5 = bs
    del b1, b2  # exactly cancelled by train-mode BN's mean subtraction

    # int8 weights with per-output-column scales (halves the dominant HBM
    # fetch vs bf16); scale is applied to the matmul output inside the kernel.
    q1, s1 = _quantize_int8_per_col(w1)
    q2, s2 = _quantize_int8_per_col(w2)
    # pad contraction dim 1000 -> 1024 with zero rows (contribute nothing)
    q1p = jnp.pad(q1, ((0, K_PAD - q1.shape[0]), (0, 0)))

    # fold the three tail Linears (no nonlinearity between them) into one
    # affine map: W = w3 @ w4 @ w5 ([128,1]), b = (b3 @ w4 + b4) @ w5 + b5
    wt = (w3 @ w4 @ w5).T             # [1, 128] f32 (row for lane reduction)
    bt = (b3 @ w4 + b4) @ w5 + b5     # [1, 1] f32

    kparams = (q1p, s1, bn["g1"], bn["be1"],
               q2, s2, bn["g2"], bn["be2"], wt, bt)
    return kparams, (q1, s1, q2, s2)


def reference_forward(x, ws, bs, bn, quant=None):
    """Original Net.forward structure (biases kept, BN in standard form, three
    separate tail Linears).  With quant=(q1,s1,q2,s2) the two big matmuls use
    the kernel's arithmetic (bf16 inputs, int-coded bf16 weights, f32
    accumulation, per-column dequant scale on the product); with quant=None it
    is the pure-f32 original module."""
    w1, w2, w3, w4, w5 = ws
    b1, b2, b3, b4, b5 = bs

    def bn_train(h, g, be):
        m = jnp.mean(h, axis=0, keepdims=True)
        v = jnp.mean((h - m) ** 2, axis=0, keepdims=True)
        return (h - m) * jax.lax.rsqrt(v + EPS) * g + be

    if quant is None:
        mm1 = lambda a: jnp.dot(a, w1)
        mm2 = lambda a: jnp.dot(a, w2)
    else:
        q1, s1, q2, s2 = quant
        mm1 = lambda a: jnp.dot(a.astype(jnp.bfloat16),
                                q1.astype(jnp.bfloat16),
                                preferred_element_type=jnp.float32) * s1
        mm2 = lambda a: jnp.dot(a.astype(jnp.bfloat16),
                                q2.astype(jnp.bfloat16),
                                preferred_element_type=jnp.float32) * s2

    h = mm1(x) + b1
    h = jnp.maximum(bn_train(h, bn["g1"], bn["be1"]), 0.0)
    h = mm2(h) + b2
    h = jnp.maximum(bn_train(h, bn["g2"], bn["be2"]), 0.0)
    h = h @ w3 + b3
    h = h @ w4 + b4
    return h @ w5 + b5


if __name__ == "__main__":
    key = jax.random.PRNGKey(0)
    k_x, k_p = jax.random.split(key)

    B = 8  # small batch (>1 so train-mode BatchNorm is well defined)
    x = jax.random.normal(k_x, (B, K_IN), jnp.float32)

    ws, bs, bn = init_params(k_p)
    kparams, ref_quant = prepare_kernel_params(ws, bs, bn)

    out = jax.jit(net_forward)(x, kparams)
    out = jax.block_until_ready(out)

    # precision-matched reference (checks the exact fusions: dropped b1/b2,
    # fused BN, folded tail, K padding, int8-dequant placement)
    ref_matched = reference_forward(x, ws, bs, bn, quant=ref_quant)
    # pure f32 reference of the original module (loose quantization check)
    ref_f32 = reference_forward(x, ws, bs, bn, quant=None)

    assert out.shape == (B, 1)
    assert jnp.allclose(out, ref_matched, atol=2e-3, rtol=2e-3), \
        float(jnp.max(jnp.abs(out - ref_matched)))
    assert jnp.allclose(out, ref_f32, atol=1e-1, rtol=1e-1), \
        float(jnp.max(jnp.abs(out - ref_f32)))

    print("KERNEL_OK")
</pallas_src>

<mosaic_0001>
module attributes {stable_mosaic.version = 11 : i64} {
  func.func @net_kernel(%arg0: memref<8x1000xf32, #tpu.memory_space<vmem>>, %arg1: memref<1024x512xi8, #tpu.memory_space<vmem>>, %arg2: memref<1x512xf32, #tpu.memory_space<vmem>>, %arg3: memref<1x512xf32, #tpu.memory_space<vmem>>, %arg4: memref<1x512xf32, #tpu.memory_space<vmem>>, %arg5: memref<512x128xi8, #tpu.memory_space<vmem>>, %arg6: memref<1x128xf32, #tpu.memory_space<vmem>>, %arg7: memref<1x128xf32, #tpu.memory_space<vmem>>, %arg8: memref<1x128xf32, #tpu.memory_space<vmem>>, %arg9: memref<1x128xf32, #tpu.memory_space<vmem>>, %arg10: memref<1x1xf32, #tpu.memory_space<vmem>>, %arg11: memref<8x1xf32, #tpu.memory_space<vmem>>, %arg12: memref<8x1024xbf16, #tpu.memory_space<vmem>>) attributes {dimension_semantics = [], scalar_prefetch = 0 : i64, scratch_operands = 1 : i64, tpu.core_type = #tpu.core_type<tc>} {
    %cst = arith.constant 0.000000e+00 : bf16
    %0 = vector.broadcast %cst : bf16 to vector<8x1024xbf16>
    %c0 = arith.constant 0 : index
    %c0_0 = arith.constant 0 : index
    %1 = vector.load %arg12[%c0, %c0_0] : memref<8x1024xbf16, #tpu.memory_space<vmem>>, vector<8x1024xbf16>
    tpu.vector_store %arg12[%c0, %c0_0], %0 {strides = array<i32>} : memref<8x1024xbf16, #tpu.memory_space<vmem>>, vector<8x1024xbf16>,
    %c0_1 = arith.constant 0 : index
    %c0_2 = arith.constant 0 : index
    %2 = vector.load %arg0[%c0_1, %c0_2] : memref<8x1000xf32, #tpu.memory_space<vmem>>, vector<8x1000xf32>
    %3 = arith.truncf %2 : vector<8x1000xf32> to vector<8x1000xbf16>
    %c0_3 = arith.constant 0 : index
    %c0_4 = arith.constant 0 : index
    %4 = vector.load %arg12[%c0_3, %c0_4] : memref<8x1024xbf16, #tpu.memory_space<vmem>>, vector<8x1000xbf16>
    tpu.vector_store %arg12[%c0_3, %c0_4], %3 {strides = array<i32>} : memref<8x1024xbf16, #tpu.memory_space<vmem>>, vector<8x1000xbf16>,
    %c0_5 = arith.constant 0 : index
    %c0_6 = arith.constant 0 : index
    %5 = vector.load %arg12[%c0_5, %c0_6] : memref<8x1024xbf16, #tpu.memory_space<vmem>>, vector<8x1024xbf16>
    %c0_7 = arith.constant 0 : index
    %c0_8 = arith.constant 0 : index
    %6 = vector.load %arg1[%c0_7, %c0_8] : memref<1024x512xi8, #tpu.memory_space<vmem>>, vector<1024x512xi8>
    %7 = arith.sitofp %6 : vector<1024x512xi8> to vector<1024x512xf32>
    %8 = arith.truncf %7 : vector<1024x512xf32> to vector<1024x512xbf16>
    %cst_9 = arith.constant dense<0.000000e+00> : vector<8x512xf32>
    %9 = tpu.matmul %5, %8, %cst_9 {dimension_numbers = #tpu.dot_dimension_numbers<[1], [0], [0], [1], [0, 0, 1, 1], [], []>} : vector<8x1024xbf16>, vector<1024x512xbf16>, vector<8x512xf32> -> vector<8x512xf32>
    %c0_10 = arith.constant 0 : index
    %c0_11 = arith.constant 0 : index
    %10 = vector.load %arg2[%c0_10, %c0_11] : memref<1x512xf32, #tpu.memory_space<vmem>>, vector<1x512xf32>
    %11 = vector.broadcast %10 : vector<1x512xf32> to vector<8x512xf32>
    %12 = arith.mulf %9, %11 : vector<8x512xf32>
    %c0_12 = arith.constant 0 : index
    %c0_13 = arith.constant 0 : index
    %13 = vector.load %arg3[%c0_12, %c0_13] : memref<1x512xf32, #tpu.memory_space<vmem>>, vector<1x512xf32>
    %c0_14 = arith.constant 0 : index
    %c0_15 = arith.constant 0 : index
    %14 = vector.load %arg4[%c0_14, %c0_15] : memref<1x512xf32, #tpu.memory_space<vmem>>, vector<1x512xf32>
    %cst_16 = arith.constant dense<0.000000e+00> : vector<512xf32>
    %15 = vector.multi_reduction <add>, %12, %cst_16 [0] : vector<8x512xf32> to vector<512xf32>
    %16 = vector.shape_cast %15 : vector<512xf32> to vector<1x512xf32>
    %cst_17 = arith.constant 8.000000e+00 : f32
    %17 = vector.broadcast %cst_17 : f32 to vector<1x512xf32>
    %18 = arith.divf %16, %17 : vector<1x512xf32>
    %19 = arith.mulf %12, %12 : vector<8x512xf32>
    %cst_18 = arith.constant dense<0.000000e+00> : vector<512xf32>
    %20 = vector.multi_reduction <add>, %19, %cst_18 [0] : vector<8x512xf32> to vector<512xf32>
    %21 = vector.shape_cast %20 : vector<512xf32> to vector<1x512xf32>
    %cst_19 = arith.constant 8.000000e+00 : f32
    %22 = vector.broadcast %cst_19 : f32 to vector<1x512xf32>
    %23 = arith.divf %21, %22 : vector<1x512xf32>
    %24 = arith.mulf %18, %18 : vector<1x512xf32>
    %25 = arith.subf %23, %24 : vector<1x512xf32>
    %cst_20 = arith.constant 0.000000e+00 : f32
    %26 = vector.broadcast %cst_20 : f32 to vector<1x512xf32>
    %27 = arith.maximumf %25, %26 : vector<1x512xf32>
    %cst_21 = arith.constant 9.99999974E-6 : f32
    %28 = vector.broadcast %cst_21 : f32 to vector<1x512xf32>
    %29 = arith.addf %27, %28 : vector<1x512xf32>
    %30 = math.rsqrt %29 : vector<1x512xf32>
    %31 = arith.mulf %13, %30 : vector<1x512xf32>
    %32 = arith.mulf %18, %31 : vector<1x512xf32>
    %33 = arith.subf %14, %32 : vector<1x512xf32>
    %34 = vector.broadcast %31 : vector<1x512xf32> to vector<8x512xf32>
    %35 = arith.mulf %12, %34 : vector<8x512xf32>
    %36 = vector.broadcast %33 : vector<1x512xf32> to vector<8x512xf32>
    %37 = arith.addf %35, %36 : vector<8x512xf32>
    %cst_22 = arith.constant 0.000000e+00 : f32
    %38 = vector.broadcast %cst_22 : f32 to vector<8x512xf32>
    %39 = arith.maximumf %37, %38 : vector<8x512xf32>
    %40 = arith.truncf %39 : vector<8x512xf32> to vector<8x512xbf16>
    %c0_23 = arith.constant 0 : index
    %c0_24 = arith.constant 0 : index
    %41 = vector.load %arg5[%c0_23, %c0_24] : memref<512x128xi8, #tpu.memory_space<vmem>>, vector<512x128xi8>
    %42 = arith.sitofp %41 : vector<512x128xi8> to vector<512x128xf32>
    %43 = arith.truncf %42 : vector<512x128xf32> to vector<512x128xbf16>
    %cst_25 = arith.constant dense<0.000000e+00> : vector<8x128xf32>
    %44 = tpu.matmul %40, %43, %cst_25 {dimension_numbers = #tpu.dot_dimension_numbers<[1], [0], [0], [1], [0, 0, 1, 1], [], []>} : vector<8x512xbf16>, vector<512x128xbf16>, vector<8x128xf32> -> vector<8x128xf32>
    %c0_26 = arith.constant 0 : index
    %c0_27 = arith.constant 0 : index
    %45 = vector.load %arg6[%c0_26, %c0_27] : memref<1x128xf32, #tpu.memory_space<vmem>>, vector<1x128xf32>
    %46 = vector.broadcast %45 : vector<1x128xf32> to vector<8x128xf32>
    %47 = arith.mulf %44, %46 : vector<8x128xf32>
    %c0_28 = arith.constant 0 : index
    %c0_29 = arith.constant 0 : index
    %48 = vector.load %arg7[%c0_28, %c0_29] : memref<1x128xf32, #tpu.memory_space<vmem>>, vector<1x128xf32>
    %c0_30 = arith.constant 0 : index
    %c0_31 = arith.constant 0 : index
    %49 = vector.load %arg8[%c0_30, %c0_31] : memref<1x128xf32, #tpu.memory_space<vmem>>, vector<1x128xf32>
    %cst_32 = arith.constant dense<0.000000e+00> : vector<128xf32>
    %50 = vector.multi_reduction <add>, %47, %cst_32 [0] : vector<8x128xf32> to vector<128xf32>
    %51 = vector.shape_cast %50 : vector<128xf32> to vector<1x128xf32>
    %cst_33 = arith.constant 8.000000e+00 : f32
    %52 = vector.broadcast %cst_33 : f32 to vector<1x128xf32>
    %53 = arith.divf %51, %52 : vector<1x128xf32>
    %54 = arith.mulf %47, %47 : vector<8x128xf32>
    %cst_34 = arith.constant dense<0.000000e+00> : vector<128xf32>
    %55 = vector.multi_reduction <add>, %54, %cst_34 [0] : vector<8x128xf32> to vector<128xf32>
    %56 = vector.shape_cast %55 : vector<128xf32> to vector<1x128xf32>
    %cst_35 = arith.constant 8.000000e+00 : f32
    %57 = vector.broadcast %cst_35 : f32 to vector<1x128xf32>
    %58 = arith.divf %56, %57 : vector<1x128xf32>
    %59 = arith.mulf %53, %53 : vector<1x128xf32>
    %60 = arith.subf %58, %59 : vector<1x128xf32>
    %cst_36 = arith.constant 0.000000e+00 : f32
    %61 = vector.broadcast %cst_36 : f32 to vector<1x128xf32>
    %62 = arith.maximumf %60, %61 : vector<1x128xf32>
    %cst_37 = arith.constant 9.99999974E-6 : f32
    %63 = vector.broadcast %cst_37 : f32 to vector<1x128xf32>
    %64 = arith.addf %62, %63 : vector<1x128xf32>
    %65 = math.rsqrt %64 : vector<1x128xf32>
    %66 = arith.mulf %48, %65 : vector<1x128xf32>
    %67 = arith.mulf %53, %66 : vector<1x128xf32>
    %68 = arith.subf %49, %67 : vector<1x128xf32>
    %69 = vector.broadcast %66 : vector<1x128xf32> to vector<8x128xf32>
    %70 = arith.mulf %47, %69 : vector<8x128xf32>
    %71 = vector.broadcast %68 : vector<1x128xf32> to vector<8x128xf32>
    %72 = arith.addf %70, %71 : vector<8x128xf32>
    %cst_38 = arith.constant 0.000000e+00 : f32
    %73 = vector.broadcast %cst_38 : f32 to vector<8x128xf32>
    %74 = arith.maximumf %72, %73 : vector<8x128xf32>
    %c0_39 = arith.constant 0 : index
    %c0_40 = arith.constant 0 : index
    %75 = vector.load %arg9[%c0_39, %c0_40] : memref<1x128xf32, #tpu.memory_space<vmem>>, vector<1x128xf32>
    %76 = vector.broadcast %75 : vector<1x128xf32> to vector<8x128xf32>
    %77 = arith.mulf %74, %76 : vector<8x128xf32>
    %cst_41 = arith.constant dense<0.000000e+00> : vector<8xf32>
    %78 = vector.multi_reduction <add>, %77, %cst_41 [1] : vector<8x128xf32> to vector<8xf32>
    %79 = vector.shape_cast %78 : vector<8xf32> to vector<8x1xf32>
    %c0_42 = arith.constant 0 : index
    %c0_43 = arith.constant 0 : index
    %80 = vector.load %arg10[%c0_42, %c0_43] : memref<1x1xf32, #tpu.memory_space<vmem>>, vector<1x1xf32>
    %81 = vector.broadcast %80 : vector<1x1xf32> to vector<8x1xf32>
    %82 = arith.addf %79, %81 : vector<8x1xf32>
    %c0_44 = arith.constant 0 : index
    %c0_45 = arith.constant 0 : index
    %83 = vector.load %arg11[%c0_44, %c0_45] : memref<8x1xf32, #tpu.memory_space<vmem>>, vector<8x1xf32>
    tpu.vector_store %arg11[%c0_44, %c0_45], %82 {strides = array<i32>} : memref<8x1xf32, #tpu.memory_space<vmem>>, vector<8x1xf32>,
    return
  }
}

</mosaic_0001>

<bundles_post_ra>
// kernel: net_forward.1
= control target key start
LH: loop header
LB: loop body
LE: loop exit
PB: predicated region body
PF: predicated region fallthrough
CT: control target
= control target key end

     0   :  { %s1707_s0 = inlined_call_operand.hbm [shape: f32[8,1000], index: 0, kind: input, shape index: {}]   ;;  %s1708_s1 = inlined_call_operand.hbm [shape: s8[1024,512], index: 1, kind: input, shape index: {}]   ;;  %s1709_s2 = inlined_call_operand.vmem [shape: f32[1,512], index: 2, kind: input, shape index: {}]   ;;  %s1710_s3 = inlined_call_operand.vmem [shape: f32[1,512], index: 3, kind: input, shape index: {}]   ;;  %s1711_s4 = inlined_call_operand.vmem [shape: f32[1,512], index: 4, kind: input, shape index: {}]   ;;  %s1712_s5 = inlined_call_operand.hbm [shape: s8[512,128], index: 5, kind: input, shape index: {}]   ;;  %s1713_s6 = inlined_call_operand.vmem [shape: f32[1,128], index: 6, kind: input, shape index: {}]   ;;  %s1714_s7 = inlined_call_operand.vmem [shape: f32[1,128], index: 7, kind: input, shape index: {}]   ;;  %s1715_s8 = inlined_call_operand.vmem [shape: f32[1,128], index: 8, kind: input, shape index: {}]   ;;  %s1716_s9 = inlined_call_operand.vmem [shape: f32[1,128], index: 9, kind: input, shape index: {}]   ;;  %s1717_s10 = inlined_call_operand.<no memory space> [shape: f32[1,1], index: 10, kind: input, shape index: {}]   ;;  %s1718_s11 = inlined_call_operand.vmem [shape: f32[8,1], index: 11, kind: output, shape index: {}]  }
   0x1   :  { %v16_v0 = vstv %s1717_s10 }
   0x2   :  { %17 = vst [vmem:[#allocation3] sm:$0x1] %v16_v0 }
   0x3   :  { %18 = vsyncpa [#allocation5], 0 }
   0x4   :  { %19 = vsyncpa [#allocation7], 0  ;;  %s1492_s19 = smov [#allocation6]   ;;  %s1422_s23 = scalar_lea.hbm %s1708_s1, 16384 }
   0x5   :  { %s35_s20 = sshll.u32 %s1492_s19, 4  ;;  %p1423_p0 = scmp.ne.s32.totalorder %s1708_s1, %s1422_s23  ;;  %s36_s20 = int_to_ptr.vmem [resolvable:$true] %s35_s20 }
   0x6   :  { %p1426_p1 = scmp.lt.u32.totalorder %s1422_s23, %s1708_s1 }
   0x8   :  { %p1428_p2 = pnand %p1426_p1, %p1423_p0 }
   0xa   :  { %1431 = shalt.err (!%p1428_p2)
}
   0xb   :  { %s1432_s10 = scalar_lea.vmem %s36_s20, 16384  ;;  %p1437_p4 = scmp.lt.s32.totalorder %s36_s20, %s36_s20 }
   0xc   :  { %p1433_p3 = scmp.ne.s32.totalorder %s36_s20, %s1432_s10  ;;  %p1438_p5 = scmp.lt.s32.totalorder %s1432_s10, %s1432_s10 }
   0xe   :  { %p1439_p6 = por %p1438_p5, %p1437_p4 }
  0x10   :  { %p1440_p7 = pnand %p1439_p6, %p1433_p3 }
  0x12   :  { %1443 = shalt.err (!%p1440_p7)
}
  0x13   :  { %s1493_s28 = smov 512   ;;  %s1494_s29 = smov 32  }
  0x14   :  { %41 = dma.hbm_to_vmem [thread:$0]  %s1708_s1, 16384, %s36_s20, [#allocation7], %s1493_s28, %s1493_s28, %s1494_s29  }
  0x15   :  { %s1495_s13 = smov [#allocation4]   ;;  %s1496_s15 = smov [#allocation8]  }
  0x16   :  { %s26_s14 = sshll.u32 %s1495_s13, 4  ;;  %s53_s16 = sshll.u32 %s1496_s15, 4  ;;  %s27_s14 = int_to_ptr.vmem [resolvable:$true] %s26_s14  ;;  %s54_s16 = int_to_ptr.vmem [resolvable:$true] %s53_s16 }
  0x17   :  { %s1444_s19 = scalar_lea.hbm %s1707_s0, 1024 }
  0x18   :  { %p1445_p8 = scmp.ne.s32.totalorder %s1707_s0, %s1444_s19  ;;  %p1448_p9 = scmp.lt.u32.totalorder %s1444_s19, %s1707_s0 }
  0x1a   :  { %p1450_p10 = pnand %p1448_p9, %p1445_p8 }
  0x1c   :  { %1453 = shalt.err (!%p1450_p10)
}
  0x1d   :  { %s1454_s1 = scalar_lea.vmem %s27_s14, 1024  ;;  %p1459_p12 = scmp.lt.s32.totalorder %s27_s14, %s27_s14 }
  0x1e   :  { %p1455_p11 = scmp.ne.s32.totalorder %s27_s14, %s1454_s1  ;;  %p1460_p13 = scmp.lt.s32.totalorder %s1454_s1, %s1454_s1 }
  0x20   :  { %p1461_p0 = por %p1460_p13, %p1459_p12 }
  0x22   :  { %p1462_p1 = pnand %p1461_p0, %p1455_p11 }
  0x24   :  { %1465 = shalt.err (!%p1462_p1)
}
  0x25   :  { %29 = dma.hbm_to_vmem [thread:$0]  %s1707_s0, 1024, %s27_s14, [#allocation5]  }
  0x26   :  { %s1466_s10 = scalar_lea.hbm %s1712_s5, 2048 }
  0x27   :  { %p1467_p2 = scmp.ne.s32.totalorder %s1712_s5, %s1466_s10  ;;  %p1470_p3 = scmp.lt.u32.totalorder %s1466_s10, %s1712_s5 }
  0x29   :  { %p1472_p4 = pnand %p1470_p3, %p1467_p2 }
  0x2b   :  { %1475 = shalt.err (!%p1472_p4)
}
  0x2c   :  { %s1476_s13 = scalar_lea.vmem %s54_s16, 2048  ;;  %p1481_p6 = scmp.lt.s32.totalorder %s54_s16, %s54_s16 }
  0x2d   :  { %p1477_p5 = scmp.ne.s32.totalorder %s54_s16, %s1476_s13  ;;  %p1482_p7 = scmp.lt.s32.totalorder %s1476_s13, %s1476_s13 }
  0x2f   :  { %p1483_p8 = por %p1482_p7, %p1481_p6 }
  0x31   :  { %p1484_p9 = pnand %p1483_p8, %p1477_p5 }
  0x33   :  { %1487 = shalt.err (!%p1484_p9)
}
  0x34   :  { %s1497_s0 = smov 128   ;;  %s1498_s14 = smov 8  }
  0x35   :  { %59 = dma.hbm_to_vmem [thread:$0]  %s1712_s5, 2048, %s54_s16, [#allocation7], %s1497_s0, %s1497_s0, %s1498_s14  }
  0x36   :  { %1488 = dma.done.wait [#allocation5], 1024  }
  0x37   :  { %1489 = vsyncadd [#allocation5], 4294966272 }
  0x38   :  { %1490 = dma.done.wait [#allocation7], 18432  }
  0x39   :  { %1491 = vsyncadd [#allocation7], 4294948864  ;;  %v1499_v1 = vmov 0   ;;  %v136_v2 = vld [vmem:[#allocation6 + $0x8] sm:$0xff]  ;;  %v138_v3 = vld [vmem:[#allocation6 + $0x18] sm:$0xff]  ;;  %vm127_vm0 = vcmask 1043456  }
  0x3a   :  { %83 = vst [vmem:[#allocation2 + $0x18] sm:$0xff] %v1499_v1  ;;  %v135_v4 = vld [vmem:[#allocation6] sm:$0xff]  ;;  %v264_v5 = vunpack.c.l.s8.bf16 %v136_v2  ;;  %v268_v6 = vunpack.c.h.s8.bf16 %v136_v2  ;;  %v266_v7 = vunpack.c.l.s8.bf16 %v138_v3  ;;  %v270_v8 = vunpack.c.h.s8.bf16 %v138_v3  ;;  %v137_v9 = vld [vmem:[#allocation6 + $0x10] sm:$0xff]  ;;  %v140_v12 = vld [vmem:[#allocation6 + $0x28] sm:$0xff] }
  0x3b   :  { %v263_v10 = vunpack.c.l.s8.bf16 %v135_v4  ;;  %v265_v11 = vunpack.c.l.s8.bf16 %v137_v9  ;;  %v142_v13 = vld [vmem:[#allocation6 + $0x38] sm:$0xff]  ;;  %v267_v14 = vunpack.c.h.s8.bf16 %v135_v4  ;;  %v269_v15 = vunpack.c.h.s8.bf16 %v137_v9  ;;  %v139_v18 = vld [vmem:[#allocation6 + $0x20] sm:$0xff]  ;;  %v141_v19 = vld [vmem:[#allocation6 + $0x30] sm:$0xff] }
  0x3c   :  { %547 = vmatprep.subr.bf16.mxu0 %v264_v5  ;;  %711 = vmatprep.subr.bf16.mxu1 %v266_v7  ;;  %v272_v16 = vunpack.c.l.s8.bf16 %v140_v12  ;;  %v274_v17 = vunpack.c.l.s8.bf16 %v142_v13  ;;  %v271_v20 = vunpack.c.l.s8.bf16 %v139_v18  ;;  %v273_v21 = vunpack.c.l.s8.bf16 %v141_v19  ;;  %v144_v24 = vld [vmem:[#allocation6 + $0x48] sm:$0xff]  ;;  %v146_v25 = vld [vmem:[#allocation6 + $0x58] sm:$0xff]  ;;  %v143_v30 = vld [vmem:[#allocation6 + $0x40] sm:$0xff] }
  0x3d   :  { %548 = vmatpush1.bf16.msra.mxu0 %v263_v10  ;;  %712 = vmatpush1.bf16.msra.mxu1 %v265_v11  ;;  %v276_v22 = vunpack.c.h.s8.bf16 %v140_v12  ;;  %v278_v23 = vunpack.c.h.s8.bf16 %v142_v13  ;;  %v275_v26 = vunpack.c.h.s8.bf16 %v139_v18  ;;  %v277_v27 = vunpack.c.h.s8.bf16 %v141_v19  ;;  %v145_v31 = vld [vmem:[#allocation6 + $0x50] sm:$0xff]  ;;  %v1600_v32 = vld [vmem:[#allocation4] sm:$0xff]  ;;  %v85_v33 = vld [vmem:[#allocation4 + $0x8] sm:$0xff] }
  0x3e   :  { %549 = vmatprep.subr.bf16.mxu0 %v268_v6  ;;  %713 = vmatprep.subr.bf16.mxu1 %v270_v8  ;;  %v280_v28 = vunpack.c.l.s8.bf16 %v144_v24  ;;  %v282_v29 = vunpack.c.l.s8.bf16 %v146_v25  ;;  %v279_v34 = vunpack.c.l.s8.bf16 %v143_v30  ;;  %v281_v35 = vunpack.c.l.s8.bf16 %v145_v31  ;;  %v148_v38 = vld [vmem:[#allocation6 + $0x68] sm:$0xff]  ;;  %v150_v39 = vld [vmem:[#allocation6 + $0x78] sm:$0xff]  ;;  %v147_v45 = vld [vmem:[#allocation6 + $0x60] sm:$0xff] }
  0x3f   :  { %v284_v36 = vunpack.c.h.s8.bf16 %v144_v24  ;;  %v286_v37 = vunpack.c.h.s8.bf16 %v146_v25  ;;  %v1416_v40 = vpack.c.bf16 %v85_v33, %v85_v33  ;;  %v283_v41 = vunpack.c.h.s8.bf16 %v143_v30  ;;  %v149_v46 = vld [vmem:[#allocation6 + $0x70] sm:$0xff]  ;;  %v152_v51 = vld [vmem:[#allocation6 + $0x88] sm:$0xff]  ;;  %v154_v52 = vld [vmem:[#allocation6 + $0x98] sm:$0xff] }
  0x40   :  { %v285_v42 = vunpack.c.h.s8.bf16 %v145_v31  ;;  %v288_v43 = vunpack.c.l.s8.bf16 %v148_v38  ;;  %v290_v44 = vunpack.c.l.s8.bf16 %v150_v39  ;;  %v287_v47 = vunpack.c.l.s8.bf16 %v147_v45  ;;  %v151_v57 = vld [vmem:[#allocation6 + $0x80] sm:$0xff]  ;;  %v153_v58 = vld [vmem:[#allocation6 + $0x90] sm:$0xff]  ;;  %v1604_v60 = vld [vmem:[#allocation4 + $0x18] sm:$0xff] }
  0x41   :  { %550 = vmatpush1.bf16.msra.mxu0 %v267_v14  ;;  %714 = vmatpush1.bf16.msra.mxu1 %v269_v15  ;;  %v289_v48 = vunpack.c.l.s8.bf16 %v149_v46  ;;  %v292_v49 = vunpack.c.h.s8.bf16 %v148_v38  ;;  %v294_v50 = vunpack.c.h.s8.bf16 %v150_v39  ;;  %v291_v53 = vunpack.c.h.s8.bf16 %v147_v45  ;;  %v1602_v59 = vld [vmem:[#allocation4 + $0x10] sm:$0xff]  ;;  %v156_v1 = vld [vmem:[#allocation6 + $0xa8] sm:$0xff]  ;;  %v158_v2 = vld [vmem:[#allocation6 + $0xb8] sm:$0xff] }
  0x42   :  { %551 = vmatprep.subr.bf16.mxu0 %v272_v16  ;;  %715 = vmatprep.subr.bf16.mxu1 %v274_v17  ;;  %v293_v54 = vunpack.c.h.s8.bf16 %v149_v46  ;;  %v296_v55 = vunpack.c.l.s8.bf16 %v152_v51  ;;  %v298_v56 = vunpack.c.l.s8.bf16 %v154_v52  ;;  %v295_v61 = vunpack.c.l.s8.bf16 %v151_v57  ;;  %v155_v7 = vld [vmem:[#allocation6 + $0xa0] sm:$0xff]  ;;  %v157_v8 = vld [vmem:[#allocation6 + $0xb0] sm:$0xff]  ;;  %v160_v13 = vld [vmem:[#allocation6 + $0xc8] sm:$0xff] }
  0x43   :  { %579 = vmatprep.mubr.bf16.mxu0 %v1416_v40  ;;  %743 = vmatprep.mubr.bf16.mxu1 %v1416_v40  ;;  %v297_v62 = vunpack.c.l.s8.bf16 %v153_v58  ;;  %v300_v63 = vunpack.c.h.s8.bf16 %v152_v51  ;;  %v302_v0 = vunpack.c.h.s8.bf16 %v154_v52  ;;  %v299_v3 = vunpack.c.h.s8.bf16 %v151_v57  ;;  %v162_v14 = vld [vmem:[#allocation6 + $0xd8] sm:$0xff]  ;;  %v159_v19 = vld [vmem:[#allocation6 + $0xc0] sm:$0xff]  ;;  %v164_v25 = vld [vmem:[#allocation6 + $0xe8] sm:$0xff] }
  0x44   :  { %v301_v4 = vunpack.c.h.s8.bf16 %v153_v58  ;;  %v304_v5 = vunpack.c.l.s8.bf16 %v156_v1  ;;  %v306_v6 = vunpack.c.l.s8.bf16 %v158_v2  ;;  %v303_v9 = vunpack.c.l.s8.bf16 %v155_v7  ;;  %v163_v31 = vld [vmem:[#allocation6 + $0xe0] sm:$0xff]  ;;  %v165_v33 = vld [vmem:[#allocation6 + $0xf0] sm:$0xff]  ;;  %v168_v38 = vld [vmem:[#allocation6 + $0x108] sm:$0xff] }
  0x45   :  { %552 = vmatpush1.bf16.msra.mxu0 %v271_v20  ;;  %716 = vmatpush1.bf16.msra.mxu1 %v273_v21  ;;  %v305_v10 = vunpack.c.l.s8.bf16 %v157_v8  ;;  %v308_v11 = vunpack.c.h.s8.bf16 %v156_v1  ;;  %v310_v12 = vunpack.c.h.s8.bf16 %v158_v2  ;;  %v307_v15 = vunpack.c.h.s8.bf16 %v155_v7  ;;  %v161_v20 = vld [vmem:[#allocation6 + $0xd0] sm:$0xff]  ;;  %v170_v39 = vld [vmem:[#allocation6 + $0x118] sm:$0xff]  ;;  %v1606_v46 = vld [vmem:[#allocation4 + $0x20] sm:$0xff] }
  0x46   :  { %553 = vmatprep.subr.bf16.mxu0 %v276_v22  ;;  %717 = vmatprep.subr.bf16.mxu1 %v278_v23  ;;  %v309_v16 = vunpack.c.h.s8.bf16 %v157_v8  ;;  %v312_v17 = vunpack.c.l.s8.bf16 %v160_v13  ;;  %v314_v18 = vunpack.c.l.s8.bf16 %v162_v14  ;;  %v311_v21 = vunpack.c.l.s8.bf16 %v159_v19  ;;  %v169_v45 = vld [vmem:[#allocation6 + $0x110] sm:$0xff]  ;;  %v176_v2 = vld [vmem:[#allocation6 + $0x148] sm:$0xff]  ;;  %v175_v8 = vld [vmem:[#allocation6 + $0x140] sm:$0xff] }
  0x47   :  { %v313_v22 = vunpack.c.l.s8.bf16 %v161_v20  ;;  %v316_v23 = vunpack.c.h.s8.bf16 %v160_v13  ;;  %v318_v24 = vunpack.c.h.s8.bf16 %v162_v14  ;;  %v323_v40 = vunpack.c.h.s8.bf16 %v163_v31  ;;  %v180_v14 = vld [vmem:[#allocation6 + $0x168] sm:$0xff] }
  0x48   :  { %v332_v51 = vunpack.c.h.s8.bf16 %v168_v38  ;;  %v334_v52 = vunpack.c.h.s8.bf16 %v170_v39  ;;  %v333_v57 = vunpack.c.h.s8.bf16 %v169_v45  ;;  %vm128_vm1 = vcmask 850948  }
  0x49   :  { %554 = vmatpush1.bf16.msra.mxu0 %v275_v26  ;;  %718 = vmatpush1.bf16.msra.mxu1 %v277_v27  ;;  %v166_v26 = vld [vmem:[#allocation6 + $0xf8] sm:$0xff]  ;;  %v315_v27 = vunpack.c.h.s8.bf16 %v159_v19  ;;  %vm129_vm2 = vmor %vm128_vm1, %vm127_vm0  ;;  %vm1300_vm3 = vcmask 7168  }
  0x4a   :  { %555 = vmatprep.subr.bf16.mxu0 %v280_v28  ;;  %719 = vmatprep.subr.bf16.mxu1 %v282_v29  ;;  %v317_v28 = vunpack.c.h.s8.bf16 %v161_v20  ;;  %v320_v29 = vunpack.c.l.s8.bf16 %v164_v25  ;;  %v322_v30 = vunpack.c.l.s8.bf16 %v166_v26  ;;  %v179_v20 = vld [vmem:[#allocation6 + $0x160] sm:$0xff] }
  0x4d   :  { %556 = vmatpush1.bf16.msra.mxu0 %v279_v34  ;;  %720 = vmatpush1.bf16.msra.mxu1 %v281_v35  ;;  %v319_v34 = vunpack.c.l.s8.bf16 %v163_v31  ;;  %v321_v35 = vunpack.c.l.s8.bf16 %v165_v33 }
  0x4e   :  { %557 = vmatprep.subr.bf16.mxu0 %v284_v36  ;;  %721 = vmatprep.subr.bf16.mxu1 %v286_v37  ;;  %v324_v36 = vunpack.c.h.s8.bf16 %v164_v25  ;;  %v326_v37 = vunpack.c.h.s8.bf16 %v166_v26  ;;  %v184_v26 = vld [vmem:[#allocation6 + $0x188] sm:$0xff] }
  0x51   :  { %558 = vmatpush1.bf16.msra.mxu0 %v283_v41  ;;  %722 = vmatpush1.bf16.msra.mxu1 %v285_v42  ;;  %v325_v41 = vunpack.c.h.s8.bf16 %v165_v33  ;;  %v328_v42 = vunpack.c.l.s8.bf16 %v168_v38  ;;  %v183_v33 = vld [vmem:[#allocation6 + $0x180] sm:$0xff] }
  0x52   :  { %559 = vmatprep.subr.bf16.mxu0 %v288_v43  ;;  %723 = vmatprep.subr.bf16.mxu1 %v290_v44  ;;  %v330_v43 = vunpack.c.l.s8.bf16 %v170_v39  ;;  %v167_v44 = vld [vmem:[#allocation6 + $0x100] sm:$0xff]  ;;  %v188_v39 = vld [vmem:[#allocation6 + $0x1a8] sm:$0xff] }
  0x55   :  { %560 = vmatpush1.bf16.msra.mxu0 %v287_v47  ;;  %724 = vmatpush1.bf16.msra.mxu1 %v289_v48  ;;  %v1608_v47 = vld [vmem:[#allocation4 + $0x28] sm:$0xff]  ;;  %v1417_v48 = vpack.c.bf16 %v1600_v32, %v1600_v32 }
  0x56   :  { %561 = vmatprep.subr.bf16.mxu0 %v292_v49  ;;  %725 = vmatprep.subr.bf16.mxu1 %v294_v50  ;;  %v327_v49 = vunpack.c.l.s8.bf16 %v167_v44  ;;  %v329_v50 = vunpack.c.l.s8.bf16 %v169_v45  ;;  %v187_v45 = vld [vmem:[#allocation6 + $0x1a0] sm:$0xff] }
  0x59   :  { %562 = vmatpush1.bf16.msra.mxu0 %v291_v53  ;;  %726 = vmatpush1.bf16.msra.mxu1 %v293_v54  ;;  %v172_v53 = vld [vmem:[#allocation6 + $0x128] sm:$0xff]  ;;  %v174_v54 = vld [vmem:[#allocation6 + $0x138] sm:$0xff] }
  0x5a   :  { %563 = vmatprep.subr.bf16.mxu0 %v296_v55  ;;  %727 = vmatprep.subr.bf16.mxu1 %v298_v56  ;;  %v1418_v55 = vpack.c.bf16 %v1604_v60, %v1604_v60  ;;  %v331_v56 = vunpack.c.h.s8.bf16 %v167_v44  ;;  %v336_v32 = vunpack.c.l.s8.bf16 %v172_v53  ;;  %v338_v58 = vunpack.c.l.s8.bf16 %v174_v54 }
  0x5b   :  { %v340_v60 = vunpack.c.h.s8.bf16 %v172_v53  ;;  %v342_v1 = vunpack.c.h.s8.bf16 %v174_v54  ;;  %v192_v53 = vld [vmem:[#allocation6 + $0x1c8] sm:$0xff]  ;;  %v194_v54 = vld [vmem:[#allocation6 + $0x1d8] sm:$0xff] }
  0x5d   :  { %564 = vmatpush1.bf16.msra.mxu0 %v295_v61  ;;  %728 = vmatpush1.bf16.msra.mxu1 %v297_v62  ;;  %v171_v61 = vld [vmem:[#allocation6 + $0x120] sm:$0xff]  ;;  %v173_v62 = vld [vmem:[#allocation6 + $0x130] sm:$0xff] }
  0x5e   :  { %565 = vmatprep.subr.bf16.mxu0 %v300_v63  ;;  %729 = vmatprep.subr.bf16.mxu1 %v302_v0  ;;  %v335_v63 = vunpack.c.l.s8.bf16 %v171_v61  ;;  %v337_v0 = vunpack.c.l.s8.bf16 %v173_v62 }
  0x61   :  { %566 = vmatpush1.bf16.msra.mxu0 %v299_v3  ;;  %730 = vmatpush1.bf16.msra.mxu1 %v301_v4  ;;  %v178_v3 = vld [vmem:[#allocation6 + $0x158] sm:$0xff]  ;;  %v339_v4 = vunpack.c.h.s8.bf16 %v171_v61  ;;  %v193_v61 = vld [vmem:[#allocation6 + $0x1d0] sm:$0xff] }
  0x62   :  { %567 = vmatprep.subr.bf16.mxu0 %v304_v5  ;;  %731 = vmatprep.subr.bf16.mxu1 %v306_v6  ;;  %v341_v5 = vunpack.c.h.s8.bf16 %v173_v62  ;;  %v344_v6 = vunpack.c.l.s8.bf16 %v176_v2  ;;  %v346_v7 = vunpack.c.l.s8.bf16 %v178_v3  ;;  %v350_v13 = vunpack.c.h.s8.bf16 %v178_v3 }
  0x65   :  { %568 = vmatpush1.bf16.msra.mxu0 %v303_v9  ;;  %732 = vmatpush1.bf16.msra.mxu1 %v305_v10  ;;  %v177_v9 = vld [vmem:[#allocation6 + $0x150] sm:$0xff]  ;;  %v343_v10 = vunpack.c.l.s8.bf16 %v175_v8 }
  0x66   :  { %569 = vmatprep.subr.bf16.mxu0 %v308_v11  ;;  %733 = vmatprep.subr.bf16.mxu1 %v310_v12  ;;  %v345_v11 = vunpack.c.l.s8.bf16 %v177_v9  ;;  %v348_v12 = vunpack.c.h.s8.bf16 %v176_v2  ;;  %v198_v2 = vld [vmem:[#allocation6 + $0x1f8] sm:$0xff] }
  0x69   :  { %570 = vmatpush1.bf16.msra.mxu0 %v307_v15  ;;  %734 = vmatpush1.bf16.msra.mxu1 %v309_v16  ;;  %v182_v15 = vld [vmem:[#allocation6 + $0x178] sm:$0xff]  ;;  %v347_v16 = vunpack.c.h.s8.bf16 %v175_v8  ;;  %v197_v8 = vld [vmem:[#allocation6 + $0x1f0] sm:$0xff] }
  0x6a   :  { %571 = vmatprep.subr.bf16.mxu0 %v312_v17  ;;  %735 = vmatprep.subr.bf16.mxu1 %v314_v18  ;;  %v349_v17 = vunpack.c.h.s8.bf16 %v177_v9  ;;  %v352_v18 = vunpack.c.l.s8.bf16 %v180_v14  ;;  %v354_v19 = vunpack.c.l.s8.bf16 %v182_v15  ;;  %v358_v25 = vunpack.c.h.s8.bf16 %v182_v15  ;;  %v90_v9 = vld [vmem:[#allocation4 + $0x30] sm:$0xff] }
  0x6b   :  { %v390_v15 = vunpack.c.h.s8.bf16 %v198_v2 }
  0x6d   :  { %572 = vmatpush1.bf16.msra.mxu0 %v311_v21  ;;  %736 = vmatpush1.bf16.msra.mxu1 %v313_v22  ;;  %v181_v21 = vld [vmem:[#allocation6 + $0x170] sm:$0xff]  ;;  %v351_v22 = vunpack.c.l.s8.bf16 %v179_v20 }
  0x6e   :  { %573 = vmatprep.subr.bf16.mxu0 %v316_v23  ;;  %737 = vmatprep.subr.bf16.mxu1 %v318_v24  ;;  %v353_v23 = vunpack.c.l.s8.bf16 %v181_v21  ;;  %v356_v24 = vunpack.c.h.s8.bf16 %v180_v14 }
  0x71   :  { %574 = vmatpush1.bf16.msra.mxu0 %v315_v27  ;;  %738 = vmatpush1.bf16.msra.mxu1 %v317_v28  ;;  %v186_v27 = vld [vmem:[#allocation6 + $0x198] sm:$0xff]  ;;  %v355_v28 = vunpack.c.h.s8.bf16 %v179_v20 }
  0x72   :  { %575 = vmatprep.subr.bf16.mxu0 %v320_v29  ;;  %739 = vmatprep.subr.bf16.mxu1 %v322_v30  ;;  %v357_v29 = vunpack.c.h.s8.bf16 %v181_v21  ;;  %v360_v30 = vunpack.c.l.s8.bf16 %v184_v26  ;;  %v362_v31 = vunpack.c.l.s8.bf16 %v186_v27  ;;  %v366_v38 = vunpack.c.h.s8.bf16 %v186_v27 }
  0x75   :  { %576 = vmatpush1.bf16.msra.mxu0 %v319_v34  ;;  %740 = vmatpush1.bf16.msra.mxu1 %v321_v35  ;;  %v185_v34 = vld [vmem:[#allocation6 + $0x190] sm:$0xff]  ;;  %v359_v35 = vunpack.c.l.s8.bf16 %v183_v33 }
  0x76   :  { %577 = vmatprep.subr.bf16.mxu0 %v324_v36  ;;  %741 = vmatprep.subr.bf16.mxu1 %v326_v37  ;;  %v361_v36 = vunpack.c.l.s8.bf16 %v185_v34  ;;  %v364_v37 = vunpack.c.h.s8.bf16 %v184_v26 }
  0x79   :  { %578 = vmatpush1.bf16.msra.mxu0 %v323_v40  ;;  %742 = vmatpush1.bf16.msra.mxu1 %v325_v41  ;;  %v190_v40 = vld [vmem:[#allocation6 + $0x1b8] sm:$0xff]  ;;  %v363_v41 = vunpack.c.h.s8.bf16 %v183_v33 }
  0x7a   :  { %588 = vmatprep.subr.bf16.mxu0 %v328_v42  ;;  %752 = vmatprep.subr.bf16.mxu1 %v330_v43  ;;  %v365_v42 = vunpack.c.h.s8.bf16 %v185_v34  ;;  %v368_v43 = vunpack.c.l.s8.bf16 %v188_v39  ;;  %v370_v44 = vunpack.c.l.s8.bf16 %v190_v40 }
  0x7c   :  { %580 = vmatmul.mubr.bf16.vlgmr.msra.gmra.mrb[0].mxu0 %v1417_v48  ;;  %744 = vmatmul.mubr.bf16.vlgmr.msra.gmra.mrb[0].mxu1 %v1417_v48  ;;  %v189_v48 = vld [vmem:[#allocation6 + $0x1b0] sm:$0xff] }
  0x7d   :  { %589 = vmatpush1.bf16.msra.mxu0 %v327_v49  ;;  %753 = vmatpush1.bf16.msra.mxu1 %v329_v50  ;;  %v367_v49 = vunpack.c.l.s8.bf16 %v187_v45  ;;  %v369_v50 = vunpack.c.l.s8.bf16 %v189_v48 }
  0x7e   :  { %590 = vmatprep.subr.bf16.mxu0 %v332_v51  ;;  %754 = vmatprep.subr.bf16.mxu1 %v334_v52  ;;  %v372_v51 = vunpack.c.h.s8.bf16 %v188_v39  ;;  %v374_v52 = vunpack.c.h.s8.bf16 %v190_v40 }
  0x7f   :  { %620 = vmatprep.mubr.bf16.mxu0 %v1418_v55  ;;  %784 = vmatprep.mubr.bf16.mxu1 %v1418_v55  ;;  %v371_v55 = vunpack.c.h.s8.bf16 %v187_v45 }
  0x81   :  { %591 = vmatpush1.bf16.msra.mxu0 %v331_v56  ;;  %755 = vmatpush1.bf16.msra.mxu1 %v333_v57  ;;  %v373_v56 = vunpack.c.h.s8.bf16 %v189_v48  ;;  %v376_v57 = vunpack.c.l.s8.bf16 %v192_v53 }
  0x82   :  { %592 = vmatprep.subr.bf16.mxu0 %v336_v32  ;;  %756 = vmatprep.subr.bf16.mxu1 %v338_v58  ;;  %v378_v32 = vunpack.c.l.s8.bf16 %v194_v54  ;;  %v191_v58 = vld [vmem:[#allocation6 + $0x1c0] sm:$0xff] }
  0x83   :  { %v375_v62 = vunpack.c.l.s8.bf16 %v191_v58  ;;  %v379_v3 = vunpack.c.h.s8.bf16 %v191_v58 }
  0x85   :  { %593 = vmatpush1.bf16.msra.mxu0 %v335_v63  ;;  %757 = vmatpush1.bf16.msra.mxu1 %v337_v0  ;;  %v377_v63 = vunpack.c.l.s8.bf16 %v193_v61  ;;  %v380_v0 = vunpack.c.h.s8.bf16 %v192_v53 }
  0x86   :  { %594 = vmatprep.subr.bf16.mxu0 %v340_v60  ;;  %758 = vmatprep.subr.bf16.mxu1 %v342_v1  ;;  %v382_v60 = vunpack.c.h.s8.bf16 %v194_v54  ;;  %v196_v1 = vld [vmem:[#allocation6 + $0x1e8] sm:$0xff] }
  0x87   :  { %v388_v14 = vunpack.c.h.s8.bf16 %v196_v1 }
  0x89   :  { %595 = vmatpush1.bf16.msra.mxu0 %v339_v4  ;;  %759 = vmatpush1.bf16.msra.mxu1 %v341_v5  ;;  %v381_v4 = vunpack.c.h.s8.bf16 %v193_v61  ;;  %v195_v5 = vld [vmem:[#allocation6 + $0x1e0] sm:$0xff] }
  0x8a   :  { %596 = vmatprep.subr.bf16.mxu0 %v344_v6  ;;  %760 = vmatprep.subr.bf16.mxu1 %v346_v7  ;;  %v384_v6 = vunpack.c.l.s8.bf16 %v196_v1  ;;  %v386_v7 = vunpack.c.l.s8.bf16 %v198_v2 }
  0x8d   :  { %597 = vmatpush1.bf16.msra.mxu0 %v343_v10  ;;  %761 = vmatpush1.bf16.msra.mxu1 %v345_v11  ;;  %v91_v10 = vld [vmem:[#allocation4 + $0x38] sm:$0xff] }
  0x8e   :  { %598 = vmatprep.subr.bf16.mxu0 %v348_v12  ;;  %762 = vmatprep.subr.bf16.mxu1 %v350_v13  ;;  %v1326_v11 = vpack.c.bf16 %v91_v10, %v90_v9  ;;  %v383_v12 = vunpack.c.l.s8.bf16 %v195_v5  ;;  %v385_v13 = vunpack.c.l.s8.bf16 %v197_v8  ;;  %v215_v9 = vld [vmem:[#allocation6 + $0x280] sm:$0xff]  ;;  %v217_v10 = vld [vmem:[#allocation6 + $0x290] sm:$0xff] }
  0x90   :  { %130 = vst.msk [vmem:[#allocation2 + $0x18] sm:$0xff] %vm129_vm2, %v1326_v11  ;;  %v423_v11 = vunpack.c.l.s8.bf16 %v215_v9 }
  0x91   :  { %599 = vmatpush1.bf16.msra.mxu0 %v347_v16  ;;  %763 = vmatpush1.bf16.msra.mxu1 %v349_v17  ;;  %v200_v16 = vld [vmem:[#allocation6 + $0x208] sm:$0xff]  ;;  %v202_v17 = vld [vmem:[#allocation6 + $0x218] sm:$0xff] }
  0x92   :  { %600 = vmatprep.subr.bf16.mxu0 %v352_v18  ;;  %764 = vmatprep.subr.bf16.mxu1 %v354_v19  ;;  %v387_v18 = vunpack.c.h.s8.bf16 %v195_v5  ;;  %v389_v19 = vunpack.c.h.s8.bf16 %v197_v8  ;;  %v392_v20 = vunpack.c.l.s8.bf16 %v200_v16  ;;  %v394_v21 = vunpack.c.l.s8.bf16 %v202_v17 }
  0x93   :  { %v396_v27 = vunpack.c.h.s8.bf16 %v200_v16  ;;  %v222_v16 = vld [vmem:[#allocation6 + $0x2b8] sm:$0xff] }
  0x95   :  { %601 = vmatpush1.bf16.msra.mxu0 %v351_v22  ;;  %765 = vmatpush1.bf16.msra.mxu1 %v353_v23  ;;  %v199_v22 = vld [vmem:[#allocation6 + $0x200] sm:$0xff]  ;;  %v201_v23 = vld [vmem:[#allocation6 + $0x210] sm:$0xff] }
  0x96   :  { %602 = vmatprep.subr.bf16.mxu0 %v356_v24  ;;  %766 = vmatprep.subr.bf16.mxu1 %v358_v25  ;;  %v1419_v24 = vpack.c.bf16 %v1602_v59, %v1602_v59  ;;  %v391_v25 = vunpack.c.l.s8.bf16 %v199_v22  ;;  %v393_v26 = vunpack.c.l.s8.bf16 %v201_v23  ;;  %v395_v33 = vunpack.c.h.s8.bf16 %v199_v22  ;;  %v221_v22 = vld [vmem:[#allocation6 + $0x2b0] sm:$0xff] }
  0x97   :  { %v397_v34 = vunpack.c.h.s8.bf16 %v201_v23 }
  0x99   :  { %603 = vmatpush1.bf16.msra.mxu0 %v355_v28  ;;  %767 = vmatpush1.bf16.msra.mxu1 %v357_v29  ;;  %v398_v28 = vunpack.c.h.s8.bf16 %v202_v17  ;;  %v204_v29 = vld [vmem:[#allocation6 + $0x228] sm:$0xff]  ;;  %v427_v17 = vunpack.c.h.s8.bf16 %v215_v9  ;;  %v237_v9 = vld [vmem:[#allocation6 + $0x330] sm:$0xff] }
  0x9a   :  { %604 = vmatprep.subr.bf16.mxu0 %v360_v30  ;;  %768 = vmatprep.subr.bf16.mxu1 %v362_v31  ;;  %v206_v30 = vld [vmem:[#allocation6 + $0x238] sm:$0xff]  ;;  %v1420_v31 = vpack.c.bf16 %v1608_v47, %v1608_v47  ;;  %v400_v59 = vunpack.c.l.s8.bf16 %v204_v29  ;;  %v404_v47 = vunpack.c.h.s8.bf16 %v204_v29 }
  0x9b   :  { %v406_v40 = vunpack.c.h.s8.bf16 %v206_v30 }
  0x9d   :  { %605 = vmatpush1.bf16.msra.mxu0 %v359_v35  ;;  %769 = vmatpush1.bf16.msra.mxu1 %v361_v36  ;;  %v402_v35 = vunpack.c.l.s8.bf16 %v206_v30  ;;  %v203_v36 = vld [vmem:[#allocation6 + $0x220] sm:$0xff]  ;;  %v437_v30 = vunpack.c.h.s8.bf16 %v221_v22 }
  0x9e   :  { %606 = vmatprep.subr.bf16.mxu0 %v364_v37  ;;  %770 = vmatprep.subr.bf16.mxu1 %v366_v38  ;;  %v205_v37 = vld [vmem:[#allocation6 + $0x230] sm:$0xff]  ;;  %v399_v38 = vunpack.c.l.s8.bf16 %v203_v36 }
  0x9f   :  { %v401_v39 = vunpack.c.l.s8.bf16 %v205_v37 }
  0xa1   :  { %607 = vmatpush1.bf16.msra.mxu0 %v363_v41  ;;  %771 = vmatpush1.bf16.msra.mxu1 %v365_v42  ;;  %v208_v41 = vld [vmem:[#allocation6 + $0x248] sm:$0xff]  ;;  %v210_v42 = vld [vmem:[#allocation6 + $0x258] sm:$0xff] }
  0xa2   :  { %608 = vmatprep.subr.bf16.mxu0 %v368_v43  ;;  %772 = vmatprep.subr.bf16.mxu1 %v370_v44  ;;  %v403_v43 = vunpack.c.h.s8.bf16 %v203_v36  ;;  %v405_v44 = vunpack.c.h.s8.bf16 %v205_v37  ;;  %v408_v45 = vunpack.c.l.s8.bf16 %v208_v41  ;;  %v410_v48 = vunpack.c.l.s8.bf16 %v210_v42 }
  0xa3   :  { %v412_v53 = vunpack.c.h.s8.bf16 %v208_v41  ;;  %v414_v54 = vunpack.c.h.s8.bf16 %v210_v42 }
  0xa5   :  { %609 = vmatpush1.bf16.msra.mxu0 %v367_v49  ;;  %773 = vmatpush1.bf16.msra.mxu1 %v369_v50  ;;  %v207_v49 = vld [vmem:[#allocation6 + $0x240] sm:$0xff]  ;;  %v209_v50 = vld [vmem:[#allocation6 + $0x250] sm:$0xff] }
  0xa6   :  { %610 = vmatprep.subr.bf16.mxu0 %v372_v51  ;;  %774 = vmatprep.subr.bf16.mxu1 %v374_v52  ;;  %v407_v51 = vunpack.c.l.s8.bf16 %v207_v49  ;;  %v409_v52 = vunpack.c.l.s8.bf16 %v209_v50 }
  0xa9   :  { %611 = vmatpush1.bf16.msra.mxu0 %v371_v55  ;;  %775 = vmatpush1.bf16.msra.mxu1 %v373_v56  ;;  %v212_v55 = vld [vmem:[#allocation6 + $0x268] sm:$0xff]  ;;  %v214_v56 = vld [vmem:[#allocation6 + $0x278] sm:$0xff] }
  0xaa   :  { %612 = vmatprep.subr.bf16.mxu0 %v376_v57  ;;  %776 = vmatprep.subr.bf16.mxu1 %v378_v32  ;;  %v411_v57 = vunpack.c.h.s8.bf16 %v207_v49  ;;  %v413_v32 = vunpack.c.h.s8.bf16 %v209_v50  ;;  %v416_v58 = vunpack.c.l.s8.bf16 %v212_v55  ;;  %v418_v61 = vunpack.c.l.s8.bf16 %v214_v56 }
  0xab   :  { %v420_v1 = vunpack.c.h.s8.bf16 %v212_v55  ;;  %v422_v2 = vunpack.c.h.s8.bf16 %v214_v56 }
  0xad   :  { %613 = vmatpush1.bf16.msra.mxu0 %v375_v62  ;;  %777 = vmatpush1.bf16.msra.mxu1 %v377_v63  ;;  %v211_v62 = vld [vmem:[#allocation6 + $0x260] sm:$0xff]  ;;  %v213_v63 = vld [vmem:[#allocation6 + $0x270] sm:$0xff] }
  0xae   :  { %614 = vmatprep.subr.bf16.mxu0 %v380_v0  ;;  %778 = vmatprep.subr.bf16.mxu1 %v382_v60  ;;  %v415_v0 = vunpack.c.l.s8.bf16 %v211_v62  ;;  %v417_v60 = vunpack.c.l.s8.bf16 %v213_v63  ;;  %v419_v5 = vunpack.c.h.s8.bf16 %v211_v62  ;;  %v1620_v62 = vld [vmem:[#allocation2 + $0x18] sm:$0xff] }
  0xb1   :  { %615 = vmatpush1.bf16.msra.mxu0 %v379_v3  ;;  %779 = vmatpush1.bf16.msra.mxu1 %v381_v4  ;;  %v216_v3 = vld [vmem:[#allocation6 + $0x288] sm:$0xff]  ;;  %v218_v4 = vld [vmem:[#allocation6 + $0x298] sm:$0xff] }
  0xb2   :  { %616 = vmatprep.subr.bf16.mxu0 %v384_v6  ;;  %780 = vmatprep.subr.bf16.mxu1 %v386_v7  ;;  %v421_v6 = vunpack.c.h.s8.bf16 %v213_v63  ;;  %v424_v7 = vunpack.c.l.s8.bf16 %v216_v3  ;;  %v426_v8 = vunpack.c.l.s8.bf16 %v218_v4 }
  0xb5   :  { %617 = vmatpush1.bf16.msra.mxu0 %v383_v12  ;;  %781 = vmatpush1.bf16.msra.mxu1 %v385_v13  ;;  %v425_v12 = vunpack.c.l.s8.bf16 %v217_v10  ;;  %v428_v13 = vunpack.c.h.s8.bf16 %v216_v3  ;;  %v238_v3 = vld [vmem:[#allocation6 + $0x338] sm:$0xff] }
  0xb6   :  { %618 = vmatprep.subr.bf16.mxu0 %v388_v14  ;;  %782 = vmatprep.subr.bf16.mxu1 %v390_v15  ;;  %v430_v14 = vunpack.c.h.s8.bf16 %v218_v4  ;;  %v220_v15 = vld [vmem:[#allocation6 + $0x2a8] sm:$0xff]  ;;  %v1319_v4 = vcombine.high %v1620_v62, %v1620_v62 }
  0xb9   :  { %619 = vmatpush1.bf16.msra.mxu0 %v387_v18  ;;  %783 = vmatpush1.bf16.msra.mxu1 %v389_v19  ;;  %v429_v18 = vunpack.c.h.s8.bf16 %v217_v10  ;;  %v432_v19 = vunpack.c.l.s8.bf16 %v220_v15 }
  0xba   :  { %629 = vmatprep.subr.bf16.mxu0 %v392_v20  ;;  %793 = vmatprep.subr.bf16.mxu1 %v394_v21  ;;  %v434_v20 = vunpack.c.l.s8.bf16 %v222_v16  ;;  %v219_v21 = vld [vmem:[#allocation6 + $0x2a0] sm:$0xff] }
  0xbb   :  { %v431_v23 = vunpack.c.l.s8.bf16 %v219_v21  ;;  %v435_v29 = vunpack.c.h.s8.bf16 %v219_v21  ;;  %v241_v21 = vld [vmem:[#allocation6 + $0x350] sm:$0xff] }
  0xbc   :  { %621 = vmatmul.mubr.bf16.vlgmr.msra.gmra.mrb[0].mxu0 %v1419_v24  ;;  %785 = vmatmul.mubr.bf16.vlgmr.msra.gmra.mrb[0].mxu1 %v1419_v24  ;;  %v433_v24 = vunpack.c.l.s8.bf16 %v221_v22 }
  0xbd   :  { %630 = vmatpush1.bf16.msra.mxu0 %v391_v25  ;;  %794 = vmatpush1.bf16.msra.mxu1 %v393_v26  ;;  %v436_v25 = vunpack.c.h.s8.bf16 %v220_v15  ;;  %v438_v26 = vunpack.c.h.s8.bf16 %v222_v16  ;;  %v242_v15 = vld [vmem:[#allocation6 + $0x358] sm:$0xff] }
  0xbe   :  { %631 = vmatprep.subr.bf16.mxu0 %v396_v27  ;;  %795 = vmatprep.subr.bf16.mxu1 %v398_v28  ;;  %v224_v27 = vld [vmem:[#allocation6 + $0x2c8] sm:$0xff]  ;;  %v226_v28 = vld [vmem:[#allocation6 + $0x2d8] sm:$0xff] }
  0xbf   :  { %661 = vmatprep.mubr.bf16.mxu0 %v1420_v31  ;;  %825 = vmatprep.mubr.bf16.mxu1 %v1420_v31  ;;  %v440_v31 = vunpack.c.l.s8.bf16 %v224_v27  ;;  %v444_v37 = vunpack.c.h.s8.bf16 %v224_v27  ;;  %v246_v27 = vld [vmem:[#allocation6 + $0x378] sm:$0xff] }
  0xc1   :  { %632 = vmatpush1.bf16.msra.mxu0 %v395_v33  ;;  %796 = vmatpush1.bf16.msra.mxu1 %v397_v34  ;;  %v442_v33 = vunpack.c.l.s8.bf16 %v226_v28  ;;  %v223_v34 = vld [vmem:[#allocation6 + $0x2c0] sm:$0xff] }
  0xc2   :  { %633 = vmatprep.subr.bf16.mxu0 %v400_v59  ;;  %797 = vmatprep.subr.bf16.mxu1 %v402_v35  ;;  %v225_v59 = vld [vmem:[#allocation6 + $0x2d0] sm:$0xff]  ;;  %v439_v35 = vunpack.c.l.s8.bf16 %v223_v34 }
  0xc3   :  { %v441_v36 = vunpack.c.l.s8.bf16 %v225_v59  ;;  %v445_v41 = vunpack.c.h.s8.bf16 %v225_v59 }
  0xc5   :  { %634 = vmatpush1.bf16.msra.mxu0 %v399_v38  ;;  %798 = vmatpush1.bf16.msra.mxu1 %v401_v39  ;;  %v446_v38 = vunpack.c.h.s8.bf16 %v226_v28  ;;  %v228_v39 = vld [vmem:[#allocation6 + $0x2e8] sm:$0xff] }
  0xc6   :  { %635 = vmatprep.subr.bf16.mxu0 %v404_v47  ;;  %799 = vmatprep.subr.bf16.mxu1 %v406_v40  ;;  %v230_v47 = vld [vmem:[#allocation6 + $0x2f8] sm:$0xff]  ;;  %v443_v40 = vunpack.c.h.s8.bf16 %v223_v34  ;;  %v448_v42 = vunpack.c.l.s8.bf16 %v228_v39  ;;  %v452_v50 = vunpack.c.h.s8.bf16 %v228_v39  ;;  %v245_v34 = vld [vmem:[#allocation6 + $0x370] sm:$0xff] }
  0xc7   :  { %v250_v39 = vld [vmem:[#allocation6 + $0x398] sm:$0xff] }
  0xc9   :  { %636 = vmatpush1.bf16.msra.mxu0 %v403_v43  ;;  %800 = vmatpush1.bf16.msra.mxu1 %v405_v44  ;;  %v450_v43 = vunpack.c.l.s8.bf16 %v230_v47  ;;  %v227_v44 = vld [vmem:[#allocation6 + $0x2e0] sm:$0xff] }
  0xca   :  { %637 = vmatprep.subr.bf16.mxu0 %v408_v45  ;;  %801 = vmatprep.subr.bf16.mxu1 %v410_v48  ;;  %v229_v45 = vld [vmem:[#allocation6 + $0x2f0] sm:$0xff]  ;;  %v447_v48 = vunpack.c.l.s8.bf16 %v227_v44 }
  0xcb   :  { %v449_v49 = vunpack.c.l.s8.bf16 %v229_v45  ;;  %v453_v55 = vunpack.c.h.s8.bf16 %v229_v45 }
  0xcd   :  { %638 = vmatpush1.bf16.msra.mxu0 %v407_v51  ;;  %802 = vmatpush1.bf16.msra.mxu1 %v409_v52  ;;  %v454_v51 = vunpack.c.h.s8.bf16 %v230_v47  ;;  %v232_v52 = vld [vmem:[#allocation6 + $0x308] sm:$0xff] }
  0xce   :  { %639 = vmatprep.subr.bf16.mxu0 %v412_v53  ;;  %803 = vmatprep.subr.bf16.mxu1 %v414_v54  ;;  %v234_v53 = vld [vmem:[#allocation6 + $0x318] sm:$0xff]  ;;  %v451_v54 = vunpack.c.h.s8.bf16 %v227_v44  ;;  %v456_v56 = vunpack.c.l.s8.bf16 %v232_v52  ;;  %v249_v44 = vld [vmem:[#allocation6 + $0x390] sm:$0xff] }
  0xd1   :  { %640 = vmatpush1.bf16.msra.mxu0 %v411_v57  ;;  %804 = vmatpush1.bf16.msra.mxu1 %v413_v32  ;;  %v458_v57 = vunpack.c.l.s8.bf16 %v234_v53  ;;  %v231_v32 = vld [vmem:[#allocation6 + $0x300] sm:$0xff] }
  0xd2   :  { %641 = vmatprep.subr.bf16.mxu0 %v416_v58  ;;  %805 = vmatprep.subr.bf16.mxu1 %v418_v61  ;;  %v233_v58 = vld [vmem:[#allocation6 + $0x310] sm:$0xff]  ;;  %v1421_v61 = vpack.c.bf16 %v1606_v46, %v1606_v46  ;;  %v455_v63 = vunpack.c.l.s8.bf16 %v231_v32  ;;  %v459_v46 = vunpack.c.h.s8.bf16 %v231_v32 }
  0xd3   :  { %v253_v32 = vld [vmem:[#allocation6 + $0x3b0] sm:$0xff] }
  0xd5   :  { %642 = vmatpush1.bf16.msra.mxu0 %v415_v0  ;;  %806 = vmatpush1.bf16.msra.mxu1 %v417_v60  ;;  %v457_v0 = vunpack.c.l.s8.bf16 %v233_v58  ;;  %v460_v60 = vunpack.c.h.s8.bf16 %v232_v52  ;;  %v254_v52 = vld [vmem:[#allocation6 + $0x3b8] sm:$0xff] }
  0xd6   :  { %643 = vmatprep.subr.bf16.mxu0 %v420_v1  ;;  %807 = vmatprep.subr.bf16.mxu1 %v422_v2  ;;  %v462_v1 = vunpack.c.h.s8.bf16 %v234_v53  ;;  %v236_v2 = vld [vmem:[#allocation6 + $0x328] sm:$0xff] }
  0xd9   :  { %644 = vmatpush1.bf16.msra.mxu0 %v419_v5  ;;  %808 = vmatpush1.bf16.msra.mxu1 %v421_v6  ;;  %v461_v5 = vunpack.c.h.s8.bf16 %v233_v58  ;;  %v464_v6 = vunpack.c.l.s8.bf16 %v236_v2 }
  0xda   :  { %645 = vmatprep.subr.bf16.mxu0 %v424_v7  ;;  %809 = vmatprep.subr.bf16.mxu1 %v426_v8  ;;  %v466_v7 = vunpack.c.l.s8.bf16 %v238_v3  ;;  %v235_v8 = vld [vmem:[#allocation6 + $0x320] sm:$0xff] }
  0xdb   :  { %v463_v10 = vunpack.c.l.s8.bf16 %v235_v8  ;;  %v467_v16 = vunpack.c.h.s8.bf16 %v235_v8 }
  0xdd   :  { %646 = vmatpush1.bf16.msra.mxu0 %v423_v11  ;;  %810 = vmatpush1.bf16.msra.mxu1 %v425_v12  ;;  %v465_v11 = vunpack.c.l.s8.bf16 %v237_v9  ;;  %v468_v12 = vunpack.c.h.s8.bf16 %v236_v2 }
  0xde   :  { %647 = vmatprep.subr.bf16.mxu0 %v428_v13  ;;  %811 = vmatprep.subr.bf16.mxu1 %v430_v14  ;;  %v470_v13 = vunpack.c.h.s8.bf16 %v238_v3  ;;  %v240_v14 = vld [vmem:[#allocation6 + $0x348] sm:$0xff]  ;;  %v501_v3 = vunpack.c.h.s8.bf16 %v253_v32 }
  0xe1   :  { %648 = vmatpush1.bf16.msra.mxu0 %v427_v17  ;;  %812 = vmatpush1.bf16.msra.mxu1 %v429_v18  ;;  %v469_v17 = vunpack.c.h.s8.bf16 %v237_v9  ;;  %v472_v18 = vunpack.c.l.s8.bf16 %v240_v14 }
  0xe2   :  { %649 = vmatprep.subr.bf16.mxu0 %v432_v19  ;;  %813 = vmatprep.subr.bf16.mxu1 %v434_v20  ;;  %v474_v19 = vunpack.c.l.s8.bf16 %v242_v15  ;;  %v239_v20 = vld [vmem:[#allocation6 + $0x340] sm:$0xff] }
  0xe3   :  { %v471_v22 = vunpack.c.l.s8.bf16 %v239_v20  ;;  %v475_v28 = vunpack.c.h.s8.bf16 %v239_v20 }
  0xe5   :  { %650 = vmatpush1.bf16.msra.mxu0 %v431_v23  ;;  %814 = vmatpush1.bf16.msra.mxu1 %v433_v24  ;;  %v473_v23 = vunpack.c.l.s8.bf16 %v241_v21  ;;  %v476_v24 = vunpack.c.h.s8.bf16 %v240_v14 }
  0xe6   :  { %651 = vmatprep.subr.bf16.mxu0 %v436_v25  ;;  %815 = vmatprep.subr.bf16.mxu1 %v438_v26  ;;  %v478_v25 = vunpack.c.h.s8.bf16 %v242_v15  ;;  %v244_v26 = vld [vmem:[#allocation6 + $0x368] sm:$0xff] }
  0xe9   :  { %652 = vmatpush1.bf16.msra.mxu0 %v435_v29  ;;  %816 = vmatpush1.bf16.msra.mxu1 %v437_v30  ;;  %v477_v29 = vunpack.c.h.s8.bf16 %v241_v21  ;;  %v480_v30 = vunpack.c.l.s8.bf16 %v244_v26 }
  0xea   :  { %653 = vmatprep.subr.bf16.mxu0 %v440_v31  ;;  %817 = vmatprep.subr.bf16.mxu1 %v442_v33  ;;  %v482_v31 = vunpack.c.l.s8.bf16 %v246_v27  ;;  %v243_v33 = vld [vmem:[#allocation6 + $0x360] sm:$0xff] }
  0xeb   :  { %v479_v59 = vunpack.c.l.s8.bf16 %v243_v33  ;;  %v483_v47 = vunpack.c.h.s8.bf16 %v243_v33 }
  0xed   :  { %654 = vmatpush1.bf16.msra.mxu0 %v439_v35  ;;  %818 = vmatpush1.bf16.msra.mxu1 %v441_v36  ;;  %v481_v35 = vunpack.c.l.s8.bf16 %v245_v34  ;;  %v484_v36 = vunpack.c.h.s8.bf16 %v244_v26  ;;  %v1110_v26 = vld [vmem:[#allocation8 + $0x20] sm:$0xff] }
  0xee   :  { %655 = vmatprep.subr.bf16.mxu0 %v444_v37  ;;  %819 = vmatprep.subr.bf16.mxu1 %v446_v38  ;;  %v486_v37 = vunpack.c.h.s8.bf16 %v246_v27  ;;  %v248_v38 = vld [vmem:[#allocation6 + $0x388] sm:$0xff]  ;;  %v1118_v27 = vld [vmem:[#allocation8 + $0x60] sm:$0xff] }
  0xf1   :  { %656 = vmatpush1.bf16.msra.mxu0 %v443_v40  ;;  %820 = vmatpush1.bf16.msra.mxu1 %v445_v41  ;;  %v485_v40 = vunpack.c.h.s8.bf16 %v245_v34  ;;  %v488_v41 = vunpack.c.l.s8.bf16 %v248_v38 }
  0xf2   :  { %657 = vmatprep.subr.bf16.mxu0 %v448_v42  ;;  %821 = vmatprep.subr.bf16.mxu1 %v450_v43  ;;  %v490_v42 = vunpack.c.l.s8.bf16 %v250_v39  ;;  %v247_v43 = vld [vmem:[#allocation6 + $0x380] sm:$0xff] }
  0xf3   :  { %v487_v45 = vunpack.c.l.s8.bf16 %v247_v43  ;;  %v491_v53 = vunpack.c.h.s8.bf16 %v247_v43 }
  0xf5   :  { %658 = vmatpush1.bf16.msra.mxu0 %v447_v48  ;;  %822 = vmatpush1.bf16.msra.mxu1 %v449_v49  ;;  %v489_v48 = vunpack.c.l.s8.bf16 %v249_v44  ;;  %v492_v49 = vunpack.c.h.s8.bf16 %v248_v38  ;;  %v1119_v38 = vld [vmem:[#allocation8 + $0x68] sm:$0xff] }
  0xf6   :  { %659 = vmatprep.subr.bf16.mxu0 %v452_v50  ;;  %823 = vmatprep.subr.bf16.mxu1 %v454_v51  ;;  %v494_v50 = vunpack.c.h.s8.bf16 %v250_v39  ;;  %v252_v51 = vld [vmem:[#allocation6 + $0x3a8] sm:$0xff] }
  0xf9   :  { %660 = vmatpush1.bf16.msra.mxu0 %v451_v54  ;;  %824 = vmatpush1.bf16.msra.mxu1 %v453_v55  ;;  %v493_v54 = vunpack.c.h.s8.bf16 %v249_v44  ;;  %v496_v55 = vunpack.c.l.s8.bf16 %v252_v51 }
  0xfa   :  { %670 = vmatprep.subr.bf16.mxu0 %v456_v56  ;;  %834 = vmatprep.subr.bf16.mxu1 %v458_v57  ;;  %v498_v56 = vunpack.c.l.s8.bf16 %v254_v52  ;;  %v251_v57 = vld [vmem:[#allocation6 + $0x3a0] sm:$0xff] }
  0xfb   :  { %v495_v58 = vunpack.c.l.s8.bf16 %v251_v57  ;;  %v499_v2 = vunpack.c.h.s8.bf16 %v251_v57 }
  0xfc   :  { %662 = vmatmul.mubr.bf16.vlgmr.msra.gmra.mrb[0].mxu0 %v1421_v61  ;;  %826 = vmatmul.mubr.bf16.vlgmr.msra.gmra.mrb[0].mxu1 %v1421_v61  ;;  %v497_v61 = vunpack.c.l.s8.bf16 %v253_v32 }
  0xfd   :  { %671 = vmatpush1.bf16.msra.mxu0 %v455_v63  ;;  %835 = vmatpush1.bf16.msra.mxu1 %v457_v0  ;;  %v500_v63 = vunpack.c.h.s8.bf16 %v252_v51  ;;  %v502_v0 = vunpack.c.h.s8.bf16 %v254_v52  ;;  %v1120_v51 = vld [vmem:[#allocation8 + $0x70] sm:$0xff] }
  0xfe   :  { %672 = vmatprep.subr.bf16.mxu0 %v460_v60  ;;  %836 = vmatprep.subr.bf16.mxu1 %v462_v1  ;;  %v256_v60 = vld [vmem:[#allocation6 + $0x3c8] sm:$0xff]  ;;  %v258_v1 = vld [vmem:[#allocation6 + $0x3d8] sm:$0xff] }
  0xff   :  { %702 = vmatprep.mubr.bf16.mxu0 %v1319_v4  ;;  %866 = vmatprep.mubr.bf16.mxu1 %v1319_v4  ;;  %v504_v4 = vunpack.c.l.s8.bf16 %v256_v60  ;;  %v508_v9 = vunpack.c.h.s8.bf16 %v256_v60 }
 0x101   :  { %673 = vmatpush1.bf16.msra.mxu0 %v459_v46  ;;  %837 = vmatpush1.bf16.msra.mxu1 %v461_v5  ;;  %v506_v46 = vunpack.c.l.s8.bf16 %v258_v1  ;;  %v255_v5 = vld [vmem:[#allocation6 + $0x3c0] sm:$0xff] }
 0x102   :  { %674 = vmatprep.subr.bf16.mxu0 %v464_v6  ;;  %838 = vmatprep.subr.bf16.mxu1 %v466_v7  ;;  %v257_v6 = vld [vmem:[#allocation6 + $0x3d0] sm:$0xff]  ;;  %v503_v7 = vunpack.c.l.s8.bf16 %v255_v5 }
 0x103   :  { %v505_v8 = vunpack.c.l.s8.bf16 %v257_v6  ;;  %v509_v14 = vunpack.c.h.s8.bf16 %v257_v6 }
 0x105   :  { %675 = vmatpush1.bf16.msra.mxu0 %v463_v10  ;;  %839 = vmatpush1.bf16.msra.mxu1 %v465_v11  ;;  %v510_v10 = vunpack.c.h.s8.bf16 %v258_v1  ;;  %v260_v11 = vld [vmem:[#allocation6 + $0x3e8] sm:$0xff] }
 0x106   :  { %676 = vmatprep.subr.bf16.mxu0 %v468_v12  ;;  %840 = vmatprep.subr.bf16.mxu1 %v470_v13  ;;  %v262_v12 = vld [vmem:[#allocation6 + $0x3f8] sm:$0xff]  ;;  %v507_v13 = vunpack.c.h.s8.bf16 %v255_v5  ;;  %v512_v15 = vunpack.c.l.s8.bf16 %v260_v11  ;;  %v516_v21 = vunpack.c.h.s8.bf16 %v260_v11 }
 0x109   :  { %677 = vmatpush1.bf16.msra.mxu0 %v467_v16  ;;  %841 = vmatpush1.bf16.msra.mxu1 %v469_v17  ;;  %v514_v16 = vunpack.c.l.s8.bf16 %v262_v12  ;;  %v259_v17 = vld [vmem:[#allocation6 + $0x3e0] sm:$0xff] }
 0x10a   :  { %678 = vmatprep.subr.bf16.mxu0 %v472_v18  ;;  %842 = vmatprep.subr.bf16.mxu1 %v474_v19  ;;  %v261_v18 = vld [vmem:[#allocation6 + $0x3f0] sm:$0xff]  ;;  %v511_v19 = vunpack.c.l.s8.bf16 %v259_v17 }
 0x10b   :  { %v513_v20 = vunpack.c.l.s8.bf16 %v261_v18 }
 0x10d   :  { %679 = vmatpush1.bf16.msra.mxu0 %v471_v22  ;;  %843 = vmatpush1.bf16.msra.mxu1 %v473_v23  ;;  %v518_v22 = vunpack.c.h.s8.bf16 %v262_v12  ;;  %v515_v23 = vunpack.c.h.s8.bf16 %v259_v17 }
 0x10e   :  { %680 = vmatprep.subr.bf16.mxu0 %v476_v24  ;;  %844 = vmatprep.subr.bf16.mxu1 %v478_v25  ;;  %v517_v24 = vunpack.c.h.s8.bf16 %v261_v18  ;;  %v1318_v25 = vcombine.low %v1620_v62, %v1620_v62 }
 0x111   :  { %681 = vmatpush1.bf16.msra.mxu0 %v475_v28  ;;  %845 = vmatpush1.bf16.msra.mxu1 %v477_v29  ;;  %v1130_v28 = vunpack.c.l.s8.bf16 %v1110_v26  ;;  %v1146_v29 = vunpack.c.l.s8.bf16 %v1118_v27 }
 0x112   :  { %682 = vmatprep.subr.bf16.mxu0 %v480_v30  ;;  %846 = vmatprep.subr.bf16.mxu1 %v482_v31  ;;  %v1106_v30 = vld [vmem:[#allocation8] sm:$0xff] }
 0x113   :  { %v1114_v31 = vld [vmem:[#allocation8 + $0x40] sm:$0xff]  ;;  %v1122_v33 = vunpack.c.l.s8.bf16 %v1106_v30 }
 0x114   :  { %v1138_v34 = vunpack.c.l.s8.bf16 %v1114_v31  ;;  %v1139_v62 = vunpack.c.h.s8.bf16 %v1114_v31 }
 0x115   :  { %683 = vmatpush1.bf16.msra.mxu0 %v479_v59  ;;  %847 = vmatpush1.bf16.msra.mxu1 %v481_v35  ;;  %v1131_v59 = vunpack.c.h.s8.bf16 %v1110_v26  ;;  %v1147_v35 = vunpack.c.h.s8.bf16 %v1118_v27 }
 0x116   :  { %684 = vmatprep.subr.bf16.mxu0 %v484_v36  ;;  %848 = vmatprep.subr.bf16.mxu1 %v486_v37  ;;  %v1123_v36 = vunpack.c.h.s8.bf16 %v1106_v30  ;;  %v1111_v37 = vld [vmem:[#allocation8 + $0x28] sm:$0xff] }
 0x117   :  { %v1132_v39 = vunpack.c.l.s8.bf16 %v1111_v37  ;;  %v1133_v44 = vunpack.c.h.s8.bf16 %v1111_v37 }
 0x119   :  { %685 = vmatpush1.bf16.msra.mxu0 %v483_v47  ;;  %849 = vmatpush1.bf16.msra.mxu1 %v485_v40  ;;  %v1148_v47 = vunpack.c.l.s8.bf16 %v1119_v38  ;;  %v1107_v40 = vld [vmem:[#allocation8 + $0x8] sm:$0xff] }
 0x11a   :  { %686 = vmatprep.subr.bf16.mxu0 %v488_v41  ;;  %850 = vmatprep.subr.bf16.mxu1 %v490_v42  ;;  %v1115_v41 = vld [vmem:[#allocation8 + $0x48] sm:$0xff]  ;;  %v1124_v42 = vunpack.c.l.s8.bf16 %v1107_v40 }
 0x11b   :  { %v1140_v43 = vunpack.c.l.s8.bf16 %v1115_v41 }
 0x11d   :  { %687 = vmatpush1.bf16.msra.mxu0 %v487_v45  ;;  %851 = vmatpush1.bf16.msra.mxu1 %v489_v48  ;;  %v1149_v45 = vunpack.c.h.s8.bf16 %v1119_v38  ;;  %v1125_v48 = vunpack.c.h.s8.bf16 %v1107_v40 }
 0x11e   :  { %688 = vmatprep.subr.bf16.mxu0 %v492_v49  ;;  %852 = vmatprep.subr.bf16.mxu1 %v494_v50  ;;  %v1141_v49 = vunpack.c.h.s8.bf16 %v1115_v41  ;;  %v1112_v50 = vld [vmem:[#allocation8 + $0x30] sm:$0xff] }
 0x11f   :  { %v1134_v52 = vunpack.c.l.s8.bf16 %v1112_v50  ;;  %v1135_v32 = vunpack.c.h.s8.bf16 %v1112_v50 }
 0x121   :  { %689 = vmatpush1.bf16.msra.mxu0 %v491_v53  ;;  %853 = vmatpush1.bf16.msra.mxu1 %v493_v54  ;;  %v1150_v53 = vunpack.c.l.s8.bf16 %v1120_v51  ;;  %v1108_v54 = vld [vmem:[#allocation8 + $0x10] sm:$0xff] }
 0x122   :  { %690 = vmatprep.subr.bf16.mxu0 %v496_v55  ;;  %854 = vmatprep.subr.bf16.mxu1 %v498_v56  ;;  %v1116_v55 = vld [vmem:[#allocation8 + $0x50] sm:$0xff]  ;;  %v1126_v56 = vunpack.c.l.s8.bf16 %v1108_v54 }
 0x123   :  { %v1142_v57 = vunpack.c.l.s8.bf16 %v1116_v55  ;;  %v1143_v60 = vunpack.c.h.s8.bf16 %v1116_v55 }
 0x125   :  { %691 = vmatpush1.bf16.msra.mxu0 %v495_v58  ;;  %855 = vmatpush1.bf16.msra.mxu1 %v497_v61  ;;  %v1151_v58 = vunpack.c.h.s8.bf16 %v1120_v51  ;;  %v1113_v61 = vld [vmem:[#allocation8 + $0x38] sm:$0xff] }
 0x126   :  { %692 = vmatprep.subr.bf16.mxu0 %v500_v63  ;;  %856 = vmatprep.subr.bf16.mxu1 %v502_v0  ;;  %v1121_v63 = vld [vmem:[#allocation8 + $0x78] sm:$0xff]  ;;  %v1127_v0 = vunpack.c.h.s8.bf16 %v1108_v54  ;;  %v1136_v1 = vunpack.c.l.s8.bf16 %v1113_v61  ;;  %v1137_v6 = vunpack.c.h.s8.bf16 %v1113_v61 }
 0x129   :  { %693 = vmatpush1.bf16.msra.mxu0 %v499_v2  ;;  %857 = vmatpush1.bf16.msra.mxu1 %v501_v3  ;;  %v1152_v2 = vunpack.c.l.s8.bf16 %v1121_v63  ;;  %v1109_v3 = vld [vmem:[#allocation8 + $0x18] sm:$0xff] }
 0x12a   :  { %694 = vmatprep.subr.bf16.mxu0 %v504_v4  ;;  %858 = vmatprep.subr.bf16.mxu1 %v506_v46  ;;  %v1117_v4 = vld [vmem:[#allocation8 + $0x58] sm:$0xff]  ;;  %v1128_v46 = vunpack.c.l.s8.bf16 %v1109_v3 }
 0x12b   :  { %v1144_v5 = vunpack.c.l.s8.bf16 %v1117_v4 }
 0x12d   :  { %695 = vmatpush1.bf16.msra.mxu0 %v503_v7  ;;  %859 = vmatpush1.bf16.msra.mxu1 %v505_v8  ;;  %v1153_v7 = vunpack.c.h.s8.bf16 %v1121_v63  ;;  %v1129_v8 = vunpack.c.h.s8.bf16 %v1109_v3 }
 0x12e   :  { %696 = vmatprep.subr.bf16.mxu0 %v508_v9  ;;  %860 = vmatprep.subr.bf16.mxu1 %v510_v10  ;;  %v1145_v9 = vunpack.c.h.s8.bf16 %v1117_v4  ;;  %v877_v10 = vlaneseq }
 0x130   :  { %v1626_v11 = vshrl.u32 %v877_v10, 7 }
 0x131   :  { %697 = vmatpush1.bf16.msra.mxu0 %v507_v13  ;;  %861 = vmatpush1.bf16.msra.mxu1 %v509_v14  ;;  %v875_v14 = vld [vmem:[%s1709_s2] sm:$0xf] }
 0x132   :  { %698 = vmatprep.subr.bf16.mxu0 %v512_v15  ;;  %862 = vmatprep.subr.bf16.mxu1 %v514_v16  ;;  %v1629_v12 = vsub.s32 0, %v1626_v11  ;;  %v1632_v13 = vsub.s32 2, %v1626_v11  ;;  %v1638_v15 = vsub.s32 1, %v1626_v11  ;;  %v1641_v16 = vsub.s32 3, %v1626_v11 }
 0x134   :  { %v880_v17 = vrot.slane %v875_v14, %v1629_v12  ;;  %v888_v18 = vrot.slane %v875_v14, %v1632_v13 }
 0x135   :  { %699 = vmatpush1.bf16.msra.mxu0 %v511_v19  ;;  %863 = vmatpush1.bf16.msra.mxu1 %v513_v20  ;;  %v884_v19 = vrot.slane %v875_v14, %v1638_v15  ;;  %v892_v20 = vrot.slane %v875_v14, %v1641_v16 }
 0x136   :  { %700 = vmatprep.subr.bf16.mxu0 %v516_v21  ;;  %864 = vmatprep.subr.bf16.mxu1 %v518_v22 }
 0x139   :  { %701 = vmatpush1.bf16.msra.mxu0 %v515_v23  ;;  %865 = vmatpush1.bf16.msra.mxu1 %v517_v24 }
 0x13a   :  { %1327 = vmatprep.subr.bf16.mxu0 %v1130_v28  ;;  %1349 = vmatprep.subr.bf16.mxu1 %v1146_v29 }
 0x13c   :  { %703 = vmatmul.mubr.bf16.vlgmr.msra.gmra.mrb[0].mxu0 %v1318_v25  ;;  %867 = vmatmul.mubr.bf16.vlgmr.msra.gmra.mrb[0].mxu1 %v1318_v25 }
 0x13d   :  { %1328 = vmatpush3.bf16.msra.mxu0 %v1122_v33  ;;  %1350 = vmatpush3.bf16.msra.mxu1 %v1138_v34 }
 0x13e   :  { %1329 = vmatprep.subr.bf16.mxu0 %v1131_v59  ;;  %1351 = vmatprep.subr.bf16.mxu1 %v1147_v35 }
 0x141   :  { %1330 = vmatpush3.bf16.msra.mxu0 %v1123_v36  ;;  %1352 = vmatpush3.bf16.msra.mxu1 %v1139_v62 }
 0x142   :  { %1331 = vmatprep.subr.bf16.mxu0 %v1132_v39  ;;  %1353 = vmatprep.subr.bf16.mxu1 %v1148_v47 }
 0x145   :  { %1332 = vmatpush3.bf16.msra.mxu0 %v1124_v42  ;;  %1354 = vmatpush3.bf16.msra.mxu1 %v1140_v43 }
 0x146   :  { %1333 = vmatprep.subr.bf16.mxu0 %v1133_v44  ;;  %1355 = vmatprep.subr.bf16.mxu1 %v1149_v45 }
 0x149   :  { %1334 = vmatpush3.bf16.msra.mxu0 %v1125_v48  ;;  %1356 = vmatpush3.bf16.msra.mxu1 %v1141_v49 }
 0x14a   :  { %1335 = vmatprep.subr.bf16.mxu0 %v1134_v52  ;;  %1357 = vmatprep.subr.bf16.mxu1 %v1150_v53 }
 0x14d   :  { %1336 = vmatpush3.bf16.msra.mxu0 %v1126_v56  ;;  %1358 = vmatpush3.bf16.msra.mxu1 %v1142_v57 }
 0x14e   :  { %1337 = vmatprep.subr.bf16.mxu0 %v1135_v32  ;;  %1359 = vmatprep.subr.bf16.mxu1 %v1151_v58 }
 0x151   :  { %1338 = vmatpush3.bf16.msra.mxu0 %v1127_v0  ;;  %1360 = vmatpush3.bf16.msra.mxu1 %v1143_v60 }
 0x152   :  { %1339 = vmatprep.subr.bf16.mxu0 %v1136_v1  ;;  %1361 = vmatprep.subr.bf16.mxu1 %v1152_v2 }
 0x155   :  { %1340 = vmatpush3.bf16.msra.mxu0 %v1128_v46  ;;  %1362 = vmatpush3.bf16.msra.mxu1 %v1144_v5 }
 0x156   :  { %1341 = vmatprep.subr.bf16.mxu0 %v1137_v6  ;;  %1363 = vmatprep.subr.bf16.mxu1 %v1153_v7 }
 0x159   :  { %1342 = vmatpush3.bf16.msra.mxu0 %v1129_v8  ;;  %1364 = vmatpush3.bf16.msra.mxu1 %v1145_v9 }
 0x20f   :  { %v704_v21 = vpop.f32.mrb[0].mxu0  ;;  %v868_v22 = vpop.f32.mrb[0].mxu1 }
 0x210   :  { %v1647_v23 = vmul.f32 %v880_v17, %v704_v21  ;;  %v1649_v24 = vmul.f32 %v888_v18, %v868_v22  ;;  %v706_v25 = vpop.f32.mrb[1].mxu0  ;;  %v870_v26 = vpop.f32.mrb[1].mxu1 }
 0x211   :  { %v1651_v27 = vmul.f32 %v884_v19, %v706_v25  ;;  %v1653_v28 = vmul.f32 %v892_v20, %v870_v26  ;;  %v708_v29 = vpop.f32.mrb[2].mxu0  ;;  %v872_v30 = vpop.f32.mrb[2].mxu1 }
 0x212   :  { %v903_v31 = vrot.slane %v1647_v23, 4  ;;  %v932_v33 = vmul.f32 %v1647_v23, %v1647_v23  ;;  %v915_v34 = vrot.slane %v1649_v24, 4  ;;  %v934_v59 = vmul.f32 %v1649_v24, %v1649_v24  ;;  %v709_v35 = vpop.f32.mrb[3].mxu0  ;;  %v873_v36 = vpop.f32.mrb[3].mxu1 }
 0x213   :  { %v909_v62 = vrot.slane %v1651_v27, 4  ;;  %v933_v37 = vmul.f32 %v1651_v27, %v1651_v27  ;;  %v921_v38 = vrot.slane %v1653_v28, 4  ;;  %v935_v39 = vmul.f32 %v1653_v28, %v1653_v28 }
 0x214   :  { %v904_v47 = vadd.f32 %v903_v31, %v1647_v23  ;;  %v936_v40 = vrot.slane %v932_v33, 4  ;;  %v916_v41 = vadd.f32 %v915_v34, %v1649_v24  ;;  %v948_v42 = vrot.slane %v934_v59, 4 }
 0x215   :  { %v910_v43 = vadd.f32 %v909_v62, %v1651_v27  ;;  %v942_v44 = vrot.slane %v933_v37, 4  ;;  %v922_v45 = vadd.f32 %v921_v38, %v1653_v28  ;;  %v954_v48 = vrot.slane %v935_v39, 4 }
 0x216   :  { %v905_v49 = vrot.slane %v904_v47, 2  ;;  %v937_v50 = vadd.f32 %v936_v40, %v932_v33  ;;  %v917_v51 = vrot.slane %v916_v41, 2  ;;  %v949_v52 = vadd.f32 %v948_v42, %v934_v59 }
 0x217   :  { %v911_v53 = vrot.slane %v910_v43, 2  ;;  %v943_v54 = vadd.f32 %v942_v44, %v933_v37  ;;  %v923_v55 = vrot.slane %v922_v45, 2  ;;  %v955_v56 = vadd.f32 %v954_v48, %v935_v39 }
 0x218   :  { %v906_v57 = vadd.f32 %v905_v49, %v904_v47  ;;  %v938_v32 = vrot.slane %v937_v50, 2  ;;  %v918_v58 = vadd.f32 %v917_v51, %v916_v41  ;;  %v950_v61 = vrot.slane %v949_v52, 2 }
 0x219   :  { %v912_v63 = vadd.f32 %v911_v53, %v910_v43  ;;  %v944_v0 = vrot.slane %v943_v54, 2  ;;  %v924_v60 = vadd.f32 %v923_v55, %v922_v45  ;;  %v956_v1 = vrot.slane %v955_v56, 2 }
 0x21a   :  { %v907_v2 = vrot.slane %v906_v57, 1  ;;  %v939_v3 = vadd.f32 %v938_v32, %v937_v50  ;;  %v919_v4 = vrot.slane %v918_v58, 1  ;;  %v951_v46 = vadd.f32 %v950_v61, %v949_v52 }
 0x21b   :  { %v913_v5 = vrot.slane %v912_v63, 1  ;;  %v945_v6 = vadd.f32 %v944_v0, %v943_v54  ;;  %v925_v7 = vrot.slane %v924_v60, 1  ;;  %v957_v8 = vadd.f32 %v956_v1, %v955_v56 }
 0x21c   :  { %v908_v9 = vadd.f32 %v907_v2, %v906_v57  ;;  %v940_v10 = vrot.slane %v939_v3, 1  ;;  %v920_v14 = vadd.f32 %v919_v4, %v918_v58  ;;  %v952_v17 = vrot.slane %v951_v46, 1  ;;  %v901_v4 = vld [vmem:[%s1710_s3] sm:$0xf] }
 0x21d   :  { %v914_v18 = vadd.f32 %v913_v5, %v912_v63  ;;  %v946_v19 = vrot.slane %v945_v6, 1  ;;  %v926_v20 = vadd.f32 %v925_v7, %v924_v60  ;;  %v958_v21 = vrot.slane %v957_v8, 1 }
 0x21e   :  { %v928_v22 = vmul.f32 0.125, %v908_v9  ;;  %v941_v25 = vadd.f32 %v940_v10, %v939_v3  ;;  %v930_v26 = vmul.f32 0.125, %v920_v14  ;;  %v953_v29 = vadd.f32 %v952_v17, %v951_v46 }
 0x21f   :  { %v929_v30 = vmul.f32 0.125, %v914_v18  ;;  %v947_v31 = vadd.f32 %v946_v19, %v945_v6  ;;  %v931_v33 = vmul.f32 0.125, %v926_v20  ;;  %v959_v34 = vadd.f32 %v958_v21, %v957_v8 }
 0x220   :  { %v960_v59 = vmul.f32 0.125, %v941_v25  ;;  %v964_v35 = vmul.f32 %v928_v22, %v928_v22  ;;  %v962_v36 = vmul.f32 0.125, %v953_v29  ;;  %v966_v62 = vmul.f32 %v930_v26, %v930_v26 }
 0x221   :  { %v961_v37 = vmul.f32 0.125, %v947_v31  ;;  %v965_v38 = vmul.f32 %v929_v30, %v929_v30  ;;  %v963_v39 = vmul.f32 0.125, %v959_v34  ;;  %v967_v47 = vmul.f32 %v931_v33, %v931_v33 }
 0x222   :  { %v968_v40 = vsub.f32 %v960_v59, %v964_v35  ;;  %v970_v41 = vsub.f32 %v962_v36, %v966_v62  ;;  %v1500_v54 = vmov 1966171168  }
 0x223   :  { %v969_v42 = vsub.f32 %v961_v37, %v965_v38  ;;  %v971_v43 = vsub.f32 %v963_v39, %v967_v47  ;;  %v991_v55 = vunpack.c.l.s4 %v1500_v54 }
 0x224   :  { %v972_v44 = vmax.f32 %v968_v40, 0.0  ;;  %v974_v45 = vmax.f32 %v970_v41, 0.0 }
 0x225   :  { %v973_v48 = vmax.f32 %v969_v42, 0.0  ;;  %v975_v49 = vmax.f32 %v971_v43, 0.0  ;;  %v992_v56 = vunpack.c.0.s8 %v991_v55 }
 0x226   :  { %v976_v50 = vadd.f32 1e-05, %v972_v44  ;;  %v978_v51 = vadd.f32 1e-05, %v974_v45 }
 0x227   :  { %v977_v52 = vadd.f32 1e-05, %v973_v48  ;;  %v979_v53 = vadd.f32 1e-05, %v975_v49  ;;  %v995_v58 = vsub.s32 %v992_v56, %v1626_v11 }
 0x228   :  { %1406 = vrsqrt.f32 %v976_v50 }
 0x229   :  { %1408 = vrsqrt.f32 %v978_v51  ;;  %v1320_v51 = vld [vmem:[%s1713_s6] ss:$0 sm:$0xff] }
 0x22a   :  { %1410 = vrsqrt.f32 %v977_v52 }
 0x22b   :  { %1412 = vrsqrt.f32 %v979_v53 }
 0x232   :  { %v1407_v57 = vpop.eup %1406 }
 0x233   :  { %v1409_v32 = vpop.eup %1408 }
 0x234   :  { %v1411_v61 = vpop.eup %1410 }
 0x235   :  { %v1413_v63 = vpop.eup %1412  ;;  %v988_v0 = vcombine.low %v1407_v57, %v1411_v61 }
 0x236   :  { %v989_v60 = vcombine.low %v1409_v32, %v1413_v63 }
 0x237   :  { %v996_v1 = vrot.slane %v988_v0, %v995_v58 }
 0x238   :  { %v1003_v2 = vrot.slane %v989_v60, %v995_v58 }
 0x23a   :  { %v1004_v3 = vcombine.low %v996_v1, %v1003_v2 }
 0x23c   :  { %v1011_v46 = vrot.slane %v1004_v3, %v995_v58 }
 0x23e   :  { %v1013_v5 = vmul.f32 %v1011_v46, %v901_v4 }
 0x240   :  { %v1026_v6 = vrot.slane %v1013_v5, %v1632_v13  ;;  %v1030_v7 = vrot.slane %v1013_v5, %v1641_v16  ;;  %v1018_v8 = vrot.slane %v1013_v5, %v1629_v12  ;;  %v1022_v11 = vrot.slane %v1013_v5, %v1638_v15 }
 0x242   :  { %v1037_v9 = vmul.f32 %v1026_v6, %v930_v26  ;;  %v1038_v10 = vmul.f32 %v1030_v7, %v931_v33  ;;  %v1035_v14 = vmul.f32 %v1018_v8, %v928_v22  ;;  %v1036_v17 = vmul.f32 %v1022_v11, %v929_v30  ;;  %v902_v26 = vld [vmem:[%s1711_s4] sm:$0xf] }
 0x243   :  { %v1070_v18 = vmul.f32 %v1022_v11, %v1651_v27  ;;  %v1072_v19 = vmul.f32 %v1030_v7, %v1653_v28  ;;  %v1069_v20 = vmul.f32 %v1018_v8, %v1647_v23  ;;  %v1071_v21 = vmul.f32 %v1026_v6, %v1649_v24 }
 0x244   :  { %v1044_v25 = vcombine.low %v1037_v9, %v1038_v10  ;;  %v1043_v29 = vcombine.low %v1035_v14, %v1036_v17  ;;  %v1242_v10 = vld [vmem:[%s1714_s7] sm:$0x1] }
 0x246   :  { %v1058_v31 = vrot.slane %v1044_v25, %v995_v58  ;;  %v1051_v34 = vrot.slane %v1043_v29, %v995_v58 }
 0x248   :  { %v1059_v59 = vcombine.low %v1051_v34, %v1058_v31  ;;  %v1321_v34 = vld [vmem:[%s1716_s9] ss:$0 sm:$0xff] }
 0x24a   :  { %v1066_v33 = vrot.slane %v1059_v59, %v995_v58 }
 0x24c   :  { %v1068_v22 = vsub.f32 %v902_v26, %v1066_v33  ;;  %v1322_v33 = vld [vmem:[#allocation3] ss:$0 sm:$0xff] }
 0x24e   :  { %v1081_v30 = vrot.slane %v1068_v22, %v1638_v15  ;;  %v1089_v27 = vrot.slane %v1068_v22, %v1641_v16  ;;  %v1077_v28 = vrot.slane %v1068_v22, %v1629_v12  ;;  %v1085_v23 = vrot.slane %v1068_v22, %v1632_v13 }
 0x250   :  { %v1095_v24 = vadd.f32 %v1081_v30, %v1070_v18  ;;  %v1097_v35 = vadd.f32 %v1089_v27, %v1072_v19  ;;  %v1094_v36 = vadd.f32 %v1077_v28, %v1069_v20  ;;  %v1096_v62 = vadd.f32 %v1085_v23, %v1071_v21  ;;  %v1243_v18 = vld [vmem:[%s1715_s8] sm:$0x1] }
 0x252   :  { %v1099_v37 = vmax.f32 %v1095_v24, 0.0  ;;  %v1101_v38 = vmax.f32 %v1097_v35, 0.0  ;;  %v1098_v39 = vmax.f32 %v1094_v36, 0.0  ;;  %v1100_v47 = vmax.f32 %v1096_v62, 0.0 }
 0x254   :  { %v1103_v40 = vpack.c.bf16 %v1099_v37, %v1099_v37  ;;  %v1105_v41 = vpack.c.bf16 %v1101_v38, %v1101_v38  ;;  %v1102_v42 = vpack.c.bf16 %v1098_v39, %v1098_v39  ;;  %v1104_v43 = vpack.c.bf16 %v1100_v47, %v1100_v47 }
 0x256   :  { %1186 = vmatprep.mubr.bf16.mxu0 %v1103_v40  ;;  %1226 = vmatprep.mubr.bf16.mxu1 %v1105_v41 }
 0x257   :  { %1187 = vmatmul.mubr.bf16.vlgmr.msra.gmra.mrb[4].mxu0 %v1102_v42  ;;  %1227 = vmatmul.mubr.bf16.vlgmr.msra.gmra.mrb[4].mxu1 %v1104_v43 }
 0x32a   :  { %v1343_v15 = vpop.f32.mrb[4].mxu0  ;;  %v1365_v16 = vpop.f32.mrb[4].mxu1 }
 0x32b   :  { %v1344_v44 = vpop.f32.mrb[5].mxu0  ;;  %v1366_v13 = vpop.f32.mrb[5].mxu1 }
 0x32c   :  { %v1345_v45 = vadd.f32 %v1344_v44, %v1343_v15  ;;  %v1367_v48 = vadd.f32 %v1366_v13, %v1365_v16  ;;  %v1346_v49 = vpop.f32.mrb[6].mxu0  ;;  %v1368_v50 = vpop.f32.mrb[6].mxu1 }
 0x32d   :  { %v1347_v52 = vpop.f32.mrb[7].mxu0  ;;  %v1369_v53 = vpop.f32.mrb[7].mxu1 }
 0x32e   :  { %v1229_v54 = vadd.f32 %v1367_v48, %v1345_v45 }
 0x330   :  { %v1241_v55 = vmul.f32 %v1320_v51, %v1229_v54 }
 0x332   :  { %v1244_v56 = vrot.slane %v1241_v55, 4  ;;  %v1251_v57 = vmul.f32 %v1241_v55, %v1241_v55 }
 0x334   :  { %v1245_v32 = vadd.f32 %v1244_v56, %v1241_v55  ;;  %v1252_v58 = vrot.slane %v1251_v57, 4 }
 0x336   :  { %v1246_v61 = vrot.slane %v1245_v32, 2  ;;  %v1253_v63 = vadd.f32 %v1252_v58, %v1251_v57 }
 0x338   :  { %v1254_v0 = vrot.slane %v1253_v63, 2  ;;  %v1247_v60 = vadd.f32 %v1246_v61, %v1245_v32 }
 0x33a   :  { %v1255_v1 = vadd.f32 %v1254_v0, %v1253_v63  ;;  %v1248_v2 = vrot.slane %v1247_v60, 1 }
 0x33c   :  { %v1256_v3 = vrot.slane %v1255_v1, 1  ;;  %v1249_v4 = vadd.f32 %v1248_v2, %v1247_v60 }
 0x33e   :  { %v1250_v46 = vmul.f32 0.125, %v1249_v4  ;;  %v1257_v5 = vadd.f32 %v1256_v3, %v1255_v1 }
 0x340   :  { %v1258_v6 = vmul.f32 0.125, %v1257_v5  ;;  %v1259_v7 = vmul.f32 %v1250_v46, %v1250_v46 }
 0x342   :  { %v1260_v8 = vsub.f32 %v1258_v6, %v1259_v7 }
 0x344   :  { %v1261_v11 = vmax.f32 %v1260_v8, 0.0 }
 0x346   :  { %v1262_v9 = vadd.f32 1e-05, %v1261_v11 }
 0x348   :  { %1414 = vrsqrt.f32 %v1262_v9 }
 0x352   :  { %v1415_v14 = vpop.eup %1414 }
 0x353   :  { %v1264_v17 = vmul.f32 %v1415_v14, %v1242_v10 }
 0x355   :  { %v1265_v19 = vmul.f32 %v1264_v17, %v1250_v46  ;;  %v1271_v20 = vrot.slane %v1264_v17, %v1629_v12 }
 0x357   :  { %v1266_v21 = vsub.f32 %v1243_v18, %v1265_v19  ;;  %v1273_v25 = vmul.f32 %v1271_v20, %v1241_v55 }
 0x359   :  { %v1278_v29 = vrot.slane %v1266_v21, %v1629_v12 }
 0x35b   :  { %v1280_v31 = vadd.f32 %v1278_v29, %v1273_v25 }
 0x35d   :  { %v1281_v59 = vmax.f32 %v1280_v31, 0.0 }
 0x35f   :  { %v1289_v26 = vmul.f32 %v1321_v34, %v1281_v59 }
 0x361   :  { %1290 = vadd.xlane.f32.xlu0 %v1289_v26 }
 0x3ee   :  { %v1291_v22 = vpop.xlane.xlu0 %1290 }
 0x3ef   :  { %v1299_v30 = vadd.f32 %v1322_v33, %v1291_v22 }
 0x3f1   :  { %1301 = vst.msk [vmem:[%s1718_s11] sm:$0xff] %vm1300_vm3, %v1299_v30 }
 0x3f2   :  { %1306 = vsyncpa [#allocation5], 1 }
 0x3f3   :  { %1307 = vsyncpa [#allocation7], 1 }

</bundles_post_ra>
